<compile_context>
chip_gen: v5e
topology: v5e:2x2
jax: 0.10.0
libtpu: 0.0.40
codegen_flags: <defaults>
</compile_context>

<pallas_src>
import functools

import jax
import jax.numpy as jnp
from jax.experimental import pallas as pl
from jax.experimental.pallas import tpu as pltpu


# ---------------------------------------------------------------------------
# Fused forward kernel.
# ---------------------------------------------------------------------------
def seq2seq_kernel(x_ref, emb_ref,
                   enc_wih_ref, enc_whh_ref, enc_b_ref,
                   dec_wih_ref, dec_whh_ref, dec_b_ref,
                   l1_w_ref, l1_b_ref,
                   pred_ref,
                   dec_h_scr,
                   *, batch, t_enc, t_dec):
    B = batch
    H = enc_whh_ref.shape[0]

    def lstm_cell(xw_t, h, c, whh):
        # xw_t already holds x_t @ W_ih + (b_ih + b_hh); add the recurrent term.
        gates = xw_t + jnp.dot(h, whh, preferred_element_type=jnp.float32)
        i_g = jax.nn.sigmoid(gates[:, 0 * H:1 * H])
        f_g = jax.nn.sigmoid(gates[:, 1 * H:2 * H])
        g_g = jnp.tanh(gates[:, 2 * H:3 * H])
        o_g = jax.nn.sigmoid(gates[:, 3 * H:4 * H])
        c_new = f_g * c + i_g * g_g
        h_new = o_g * jnp.tanh(c_new)
        return h_new, c_new

    # ---- encoder: batch the x-path matmul over all timesteps (one MXU push) ----
    xw_enc = (jnp.dot(x_ref[...], enc_wih_ref[...],
                      preferred_element_type=jnp.float32) + enc_b_ref[...])
    enc_whh = enc_whh_ref[...]
    h = jnp.zeros((B, H), jnp.float32)
    c = jnp.zeros((B, H), jnp.float32)
    for t in range(t_enc):                      # static, fully unrolled recurrence
        h, c = lstm_cell(xw_enc[t * B:(t + 1) * B, :], h, c, enc_whh)
    # Encoder per-step outputs are discarded by the model -> never materialized.

    # ---- decoder: fused ReLU on the embeddings + batched x-path matmul ----
    emb = jnp.maximum(emb_ref[...], 0.0)        # relu(cat(a,b)) == cat(relu a, relu b)
    # TODO(synk): nn.Dropout(p=0.2) is eval-mode identity here (no RNG mask).
    xw_dec = (jnp.dot(emb, dec_wih_ref[...],
                      preferred_element_type=jnp.float32) + dec_b_ref[...])
    dec_whh = dec_whh_ref[...]
    for t in range(t_dec):
        h, c = lstm_cell(xw_dec[t * B:(t + 1) * B, :], h, c, dec_whh)
        dec_h_scr[t * B:(t + 1) * B, :] = h     # accumulate hidden slab in VMEM

    # ---- l1 + LogSoftmax over the class dim, single batched matmul ----
    z = (jnp.dot(dec_h_scr[...], l1_w_ref[...],
                 preferred_element_type=jnp.float32) + l1_b_ref[...])
    m = jnp.max(z, axis=-1, keepdims=True)
    lse = jnp.log(jnp.sum(jnp.exp(z - m), axis=-1, keepdims=True)) + m
    pred_ref[...] = z - lse                     # one contiguous output store


def seq2seq_pallas(x_flat, emb_flat, params, *, batch, t_enc, t_dec):
    n_dec = emb_flat.shape[0]                   # T_dec * B
    H = params["enc_w_hh"].shape[0]
    O = params["l1_w"].shape[-1]
    kernel = functools.partial(seq2seq_kernel, batch=batch,
                               t_enc=t_enc, t_dec=t_dec)
    return pl.pallas_call(
        kernel,
        out_shape=jax.ShapeDtypeStruct((n_dec, O), jnp.float32),
        scratch_shapes=[pltpu.VMEM((n_dec, H), jnp.float32)],
    )(x_flat, emb_flat,
      params["enc_w_ih"], params["enc_w_hh"], params["enc_b"],
      params["dec_w_ih"], params["dec_w_hh"], params["dec_b"],
      params["l1_w"], params["l1_b"])


# ---------------------------------------------------------------------------
# Parameters (deterministic synthetic init) and forward pass.
# ---------------------------------------------------------------------------
def init_params(key, input_dim, hidden_dim, embed_dim,
                tar_vocab, clip_vocab, output_dim):
    ks = jax.random.split(key, 10)
    s_h = 1.0 / float(hidden_dim) ** 0.5
    s_l = 1.0 / float(2 * embed_dim) ** 0.5

    def u(k, shape, s):
        return jax.random.uniform(k, shape, jnp.float32, -s, s)

    return dict(
        enc_w_ih=u(ks[0], (input_dim, 4 * hidden_dim), s_h),
        enc_w_hh=u(ks[1], (hidden_dim, 4 * hidden_dim), s_h),
        enc_b=u(ks[2], (1, 4 * hidden_dim), s_h),              # b_ih + b_hh combined
        dec_w_ih=u(ks[3], (2 * embed_dim, 4 * hidden_dim), s_h),
        dec_w_hh=u(ks[4], (hidden_dim, 4 * hidden_dim), s_h),
        dec_b=u(ks[5], (1, 4 * hidden_dim), s_h),
        tar_emb=jax.random.normal(ks[6], (tar_vocab, embed_dim), jnp.float32),
        clip_emb=jax.random.normal(ks[7], (clip_vocab, embed_dim), jnp.float32),
        l1_w=u(ks[8], (hidden_dim, output_dim), s_l),
        l1_b=u(ks[9], (1, output_dim), s_l),
    )


def seq2seq_lstm_merge_forward(params, x, tar_seq, clip_num):
    """x: (B, T_enc, input_dim) f32; tar_seq/clip_num: (B, T_dec) i32.
    Returns log-probabilities (B, T_dec, output_dim)."""
    B, T_enc, D_in = x.shape
    T_dec = tar_seq.shape[1]
    O = params["l1_w"].shape[-1]
    E = params["tar_emb"].shape[-1]

    # time-major flatten: row index = t*B + b.
    x_flat = jnp.transpose(x, (1, 0, 2)).reshape(T_enc * B, D_in)

    # Embedding gathers stay as plain-JAX glue (no cheap in-kernel gather here).
    emb_tar = jnp.take(params["tar_emb"], tar_seq, axis=0)     # (B, T_dec, E)
    emb_clip = jnp.take(params["clip_emb"], clip_num, axis=0)  # (B, T_dec, E)
    embedded = jnp.concatenate([emb_tar, emb_clip], axis=2)    # (B, T_dec, 2E)
    emb_flat = jnp.transpose(embedded, (1, 0, 2)).reshape(T_dec * B, 2 * E)

    pred_flat = seq2seq_pallas(x_flat, emb_flat, params,
                               batch=B, t_enc=T_enc, t_dec=T_dec)
    pred = pred_flat.reshape(T_dec, B, O).transpose(1, 0, 2)   # (B, T_dec, O)
    return pred


# ---------------------------------------------------------------------------
# Pure-JAX reference (for a coarse semantic sanity check).
# ---------------------------------------------------------------------------
def reference_forward(params, x, tar_seq, clip_num):
    H = params["enc_w_hh"].shape[0]
    hp = jax.lax.Precision.HIGHEST

    def lstm(xs_tbd, w_ih, w_hh, b, h0, c0):
        def step(carry, x_t):
            h, c = carry
            g = (jnp.dot(x_t, w_ih, precision=hp)
                 + jnp.dot(h, w_hh, precision=hp) + b)
            i = jax.nn.sigmoid(g[:, 0 * H:1 * H])
            f = jax.nn.sigmoid(g[:, 1 * H:2 * H])
            gg = jnp.tanh(g[:, 2 * H:3 * H])
            o = jax.nn.sigmoid(g[:, 3 * H:4 * H])
            c = f * c + i * gg
            h = o * jnp.tanh(c)
            return (h, c), h
        (h, c), ys = jax.lax.scan(step, (h0, c0), xs_tbd)
        return ys, h, c

    B = x.shape[0]
    h0 = jnp.zeros((B, H), jnp.float32)
    c0 = jnp.zeros((B, H), jnp.float32)
    _, h_n, c_n = lstm(jnp.transpose(x, (1, 0, 2)),
                       params["enc_w_ih"], params["enc_w_hh"], params["enc_b"],
                       h0, c0)
    emb_tar = jnp.maximum(jnp.take(params["tar_emb"], tar_seq, axis=0), 0.0)
    emb_clip = jnp.maximum(jnp.take(params["clip_emb"], clip_num, axis=0), 0.0)
    embedded = jnp.transpose(jnp.concatenate([emb_tar, emb_clip], 2), (1, 0, 2))
    dec_out, _, _ = lstm(embedded, params["dec_w_ih"], params["dec_w_hh"],
                         params["dec_b"], h_n, c_n)            # (T_dec, B, H)
    z = jnp.dot(dec_out, params["l1_w"], precision=hp) + params["l1_b"]
    pred = jax.nn.log_softmax(z, axis=-1)
    return jnp.transpose(pred, (1, 0, 2))


if __name__ == "__main__":
    # Small shapes consistent with the module (hidden_dim == 2*embed_dim as in
    # the reference defaults, so l1(embed_dim*2 -> out) applies to decoder out).
    B, T_enc, T_dec = 2, 8, 7
    input_dim, hidden_dim, embed_dim = 32, 32, 16
    tar_vocab, clip_vocab, output_dim = 7, 50, 7

    key = jax.random.PRNGKey(0)
    k_p, k_x, k_t, k_c = jax.random.split(key, 4)
    params = init_params(k_p, input_dim, hidden_dim, embed_dim,
                         tar_vocab, clip_vocab, output_dim)
    x = jax.random.normal(k_x, (B, T_enc, input_dim), jnp.float32)
    tar_seq = jax.random.randint(k_t, (B, T_dec), 0, tar_vocab, jnp.int32)
    clip_num = jax.random.randint(k_c, (B, T_dec), 0, clip_vocab, jnp.int32)

    pred = jax.jit(seq2seq_lstm_merge_forward)(params, x, tar_seq, clip_num)
    jax.block_until_ready(pred)
    assert pred.shape == (B, T_dec, output_dim)
    assert bool(jnp.all(jnp.isfinite(pred)))

    ref = reference_forward(params, x, tar_seq, clip_num)
    max_err = float(jnp.max(jnp.abs(pred - ref)))
    assert max_err < 2e-2, f"mismatch vs pure-JAX reference: {max_err}"

    print("KERNEL_OK")
</pallas_src>

<mosaic_0001>
module attributes {stable_mosaic.version = 11 : i64} {
  func.func @seq2seq_kernel(%arg0: memref<16x32xf32, #tpu.memory_space<vmem>>, %arg1: memref<14x32xf32, #tpu.memory_space<vmem>>, %arg2: memref<32x128xf32, #tpu.memory_space<vmem>>, %arg3: memref<32x128xf32, #tpu.memory_space<vmem>>, %arg4: memref<1x128xf32, #tpu.memory_space<vmem>>, %arg5: memref<32x128xf32, #tpu.memory_space<vmem>>, %arg6: memref<32x128xf32, #tpu.memory_space<vmem>>, %arg7: memref<1x128xf32, #tpu.memory_space<vmem>>, %arg8: memref<32x7xf32, #tpu.memory_space<vmem>>, %arg9: memref<1x7xf32, #tpu.memory_space<vmem>>, %arg10: memref<14x7xf32, #tpu.memory_space<vmem>>, %arg11: memref<14x32xf32, #tpu.memory_space<vmem>>) attributes {dimension_semantics = [], scalar_prefetch = 0 : i64, scratch_operands = 1 : i64, tpu.core_type = #tpu.core_type<tc>} {
    %c0 = arith.constant 0 : index
    %c0_0 = arith.constant 0 : index
    %0 = vector.load %arg0[%c0, %c0_0] : memref<16x32xf32, #tpu.memory_space<vmem>>, vector<16x32xf32>
    %c0_1 = arith.constant 0 : index
    %c0_2 = arith.constant 0 : index
    %1 = vector.load %arg2[%c0_1, %c0_2] : memref<32x128xf32, #tpu.memory_space<vmem>>, vector<32x128xf32>
    %cst = arith.constant dense<0.000000e+00> : vector<16x128xf32>
    %2 = tpu.matmul %0, %1, %cst {dimension_numbers = #tpu.dot_dimension_numbers<[1], [0], [0], [1], [0, 0, 1, 1], [], []>} : vector<16x32xf32>, vector<32x128xf32>, vector<16x128xf32> -> vector<16x128xf32>
    %c0_3 = arith.constant 0 : index
    %c0_4 = arith.constant 0 : index
    %3 = vector.load %arg4[%c0_3, %c0_4] : memref<1x128xf32, #tpu.memory_space<vmem>>, vector<1x128xf32>
    %4 = vector.broadcast %3 : vector<1x128xf32> to vector<16x128xf32>
    %5 = arith.addf %2, %4 : vector<16x128xf32>
    %c0_5 = arith.constant 0 : index
    %c0_6 = arith.constant 0 : index
    %6 = vector.load %arg3[%c0_5, %c0_6] : memref<32x128xf32, #tpu.memory_space<vmem>>, vector<32x128xf32>
    %cst_7 = arith.constant 0.000000e+00 : f32
    %7 = vector.broadcast %cst_7 : f32 to vector<2x32xf32>
    %cst_8 = arith.constant 0.000000e+00 : f32
    %8 = vector.broadcast %cst_8 : f32 to vector<2x32xf32>
    %9 = vector.extract_strided_slice %5 {offsets = [0, 0], sizes = [2, 128], strides = [1, 1]} : vector<16x128xf32> to vector<2x128xf32>
    %cst_9 = arith.constant dense<0.000000e+00> : vector<2x128xf32>
    %10 = tpu.matmul %7, %6, %cst_9 {dimension_numbers = #tpu.dot_dimension_numbers<[1], [0], [0], [1], [0, 0, 1, 1], [], []>} : vector<2x32xf32>, vector<32x128xf32>, vector<2x128xf32> -> vector<2x128xf32>
    %11 = arith.addf %9, %10 : vector<2x128xf32>
    %12 = vector.extract_strided_slice %11 {offsets = [0, 0], sizes = [2, 32], strides = [1, 1]} : vector<2x128xf32> to vector<2x32xf32>
    %13 = arith.negf %12 : vector<2x32xf32>
    %14 = math.exp %13 : vector<2x32xf32>
    %cst_10 = arith.constant 1.000000e+00 : f32
    %15 = vector.broadcast %cst_10 : f32 to vector<2x32xf32>
    %16 = arith.addf %15, %14 : vector<2x32xf32>
    %17 = arith.divf %15, %16 : vector<2x32xf32>
    %18 = vector.extract_strided_slice %11 {offsets = [0, 32], sizes = [2, 32], strides = [1, 1]} : vector<2x128xf32> to vector<2x32xf32>
    %19 = arith.negf %18 : vector<2x32xf32>
    %20 = math.exp %19 : vector<2x32xf32>
    %cst_11 = arith.constant 1.000000e+00 : f32
    %21 = vector.broadcast %cst_11 : f32 to vector<2x32xf32>
    %22 = arith.addf %21, %20 : vector<2x32xf32>
    %23 = arith.divf %21, %22 : vector<2x32xf32>
    %24 = vector.extract_strided_slice %11 {offsets = [0, 64], sizes = [2, 32], strides = [1, 1]} : vector<2x128xf32> to vector<2x32xf32>
    %25 = math.tanh %24 : vector<2x32xf32>
    %26 = vector.extract_strided_slice %11 {offsets = [0, 96], sizes = [2, 32], strides = [1, 1]} : vector<2x128xf32> to vector<2x32xf32>
    %27 = arith.negf %26 : vector<2x32xf32>
    %28 = math.exp %27 : vector<2x32xf32>
    %cst_12 = arith.constant 1.000000e+00 : f32
    %29 = vector.broadcast %cst_12 : f32 to vector<2x32xf32>
    %30 = arith.addf %29, %28 : vector<2x32xf32>
    %31 = arith.divf %29, %30 : vector<2x32xf32>
    %32 = arith.mulf %23, %8 : vector<2x32xf32>
    %33 = arith.mulf %17, %25 : vector<2x32xf32>
    %34 = arith.addf %32, %33 : vector<2x32xf32>
    %35 = math.tanh %34 : vector<2x32xf32>
    %36 = arith.mulf %31, %35 : vector<2x32xf32>
    %37 = vector.extract_strided_slice %5 {offsets = [2, 0], sizes = [2, 128], strides = [1, 1]} : vector<16x128xf32> to vector<2x128xf32>
    %cst_13 = arith.constant dense<0.000000e+00> : vector<2x128xf32>
    %38 = tpu.matmul %36, %6, %cst_13 {dimension_numbers = #tpu.dot_dimension_numbers<[1], [0], [0], [1], [0, 0, 1, 1], [], []>} : vector<2x32xf32>, vector<32x128xf32>, vector<2x128xf32> -> vector<2x128xf32>
    %39 = arith.addf %37, %38 : vector<2x128xf32>
    %40 = vector.extract_strided_slice %39 {offsets = [0, 0], sizes = [2, 32], strides = [1, 1]} : vector<2x128xf32> to vector<2x32xf32>
    %41 = arith.negf %40 : vector<2x32xf32>
    %42 = math.exp %41 : vector<2x32xf32>
    %cst_14 = arith.constant 1.000000e+00 : f32
    %43 = vector.broadcast %cst_14 : f32 to vector<2x32xf32>
    %44 = arith.addf %43, %42 : vector<2x32xf32>
    %45 = arith.divf %43, %44 : vector<2x32xf32>
    %46 = vector.extract_strided_slice %39 {offsets = [0, 32], sizes = [2, 32], strides = [1, 1]} : vector<2x128xf32> to vector<2x32xf32>
    %47 = arith.negf %46 : vector<2x32xf32>
    %48 = math.exp %47 : vector<2x32xf32>
    %cst_15 = arith.constant 1.000000e+00 : f32
    %49 = vector.broadcast %cst_15 : f32 to vector<2x32xf32>
    %50 = arith.addf %49, %48 : vector<2x32xf32>
    %51 = arith.divf %49, %50 : vector<2x32xf32>
    %52 = vector.extract_strided_slice %39 {offsets = [0, 64], sizes = [2, 32], strides = [1, 1]} : vector<2x128xf32> to vector<2x32xf32>
    %53 = math.tanh %52 : vector<2x32xf32>
    %54 = vector.extract_strided_slice %39 {offsets = [0, 96], sizes = [2, 32], strides = [1, 1]} : vector<2x128xf32> to vector<2x32xf32>
    %55 = arith.negf %54 : vector<2x32xf32>
    %56 = math.exp %55 : vector<2x32xf32>
    %cst_16 = arith.constant 1.000000e+00 : f32
    %57 = vector.broadcast %cst_16 : f32 to vector<2x32xf32>
    %58 = arith.addf %57, %56 : vector<2x32xf32>
    %59 = arith.divf %57, %58 : vector<2x32xf32>
    %60 = arith.mulf %51, %34 : vector<2x32xf32>
    %61 = arith.mulf %45, %53 : vector<2x32xf32>
    %62 = arith.addf %60, %61 : vector<2x32xf32>
    %63 = math.tanh %62 : vector<2x32xf32>
    %64 = arith.mulf %59, %63 : vector<2x32xf32>
    %65 = vector.extract_strided_slice %5 {offsets = [4, 0], sizes = [2, 128], strides = [1, 1]} : vector<16x128xf32> to vector<2x128xf32>
    %cst_17 = arith.constant dense<0.000000e+00> : vector<2x128xf32>
    %66 = tpu.matmul %64, %6, %cst_17 {dimension_numbers = #tpu.dot_dimension_numbers<[1], [0], [0], [1], [0, 0, 1, 1], [], []>} : vector<2x32xf32>, vector<32x128xf32>, vector<2x128xf32> -> vector<2x128xf32>
    %67 = arith.addf %65, %66 : vector<2x128xf32>
    %68 = vector.extract_strided_slice %67 {offsets = [0, 0], sizes = [2, 32], strides = [1, 1]} : vector<2x128xf32> to vector<2x32xf32>
    %69 = arith.negf %68 : vector<2x32xf32>
    %70 = math.exp %69 : vector<2x32xf32>
    %cst_18 = arith.constant 1.000000e+00 : f32
    %71 = vector.broadcast %cst_18 : f32 to vector<2x32xf32>
    %72 = arith.addf %71, %70 : vector<2x32xf32>
    %73 = arith.divf %71, %72 : vector<2x32xf32>
    %74 = vector.extract_strided_slice %67 {offsets = [0, 32], sizes = [2, 32], strides = [1, 1]} : vector<2x128xf32> to vector<2x32xf32>
    %75 = arith.negf %74 : vector<2x32xf32>
    %76 = math.exp %75 : vector<2x32xf32>
    %cst_19 = arith.constant 1.000000e+00 : f32
    %77 = vector.broadcast %cst_19 : f32 to vector<2x32xf32>
    %78 = arith.addf %77, %76 : vector<2x32xf32>
    %79 = arith.divf %77, %78 : vector<2x32xf32>
    %80 = vector.extract_strided_slice %67 {offsets = [0, 64], sizes = [2, 32], strides = [1, 1]} : vector<2x128xf32> to vector<2x32xf32>
    %81 = math.tanh %80 : vector<2x32xf32>
    %82 = vector.extract_strided_slice %67 {offsets = [0, 96], sizes = [2, 32], strides = [1, 1]} : vector<2x128xf32> to vector<2x32xf32>
    %83 = arith.negf %82 : vector<2x32xf32>
    %84 = math.exp %83 : vector<2x32xf32>
    %cst_20 = arith.constant 1.000000e+00 : f32
    %85 = vector.broadcast %cst_20 : f32 to vector<2x32xf32>
    %86 = arith.addf %85, %84 : vector<2x32xf32>
    %87 = arith.divf %85, %86 : vector<2x32xf32>
    %88 = arith.mulf %79, %62 : vector<2x32xf32>
    %89 = arith.mulf %73, %81 : vector<2x32xf32>
    %90 = arith.addf %88, %89 : vector<2x32xf32>
    %91 = math.tanh %90 : vector<2x32xf32>
    %92 = arith.mulf %87, %91 : vector<2x32xf32>
    %93 = vector.extract_strided_slice %5 {offsets = [6, 0], sizes = [2, 128], strides = [1, 1]} : vector<16x128xf32> to vector<2x128xf32>
    %cst_21 = arith.constant dense<0.000000e+00> : vector<2x128xf32>
    %94 = tpu.matmul %92, %6, %cst_21 {dimension_numbers = #tpu.dot_dimension_numbers<[1], [0], [0], [1], [0, 0, 1, 1], [], []>} : vector<2x32xf32>, vector<32x128xf32>, vector<2x128xf32> -> vector<2x128xf32>
    %95 = arith.addf %93, %94 : vector<2x128xf32>
    %96 = vector.extract_strided_slice %95 {offsets = [0, 0], sizes = [2, 32], strides = [1, 1]} : vector<2x128xf32> to vector<2x32xf32>
    %97 = arith.negf %96 : vector<2x32xf32>
    %98 = math.exp %97 : vector<2x32xf32>
    %cst_22 = arith.constant 1.000000e+00 : f32
    %99 = vector.broadcast %cst_22 : f32 to vector<2x32xf32>
    %100 = arith.addf %99, %98 : vector<2x32xf32>
    %101 = arith.divf %99, %100 : vector<2x32xf32>
    %102 = vector.extract_strided_slice %95 {offsets = [0, 32], sizes = [2, 32], strides = [1, 1]} : vector<2x128xf32> to vector<2x32xf32>
    %103 = arith.negf %102 : vector<2x32xf32>
    %104 = math.exp %103 : vector<2x32xf32>
    %cst_23 = arith.constant 1.000000e+00 : f32
    %105 = vector.broadcast %cst_23 : f32 to vector<2x32xf32>
    %106 = arith.addf %105, %104 : vector<2x32xf32>
    %107 = arith.divf %105, %106 : vector<2x32xf32>
    %108 = vector.extract_strided_slice %95 {offsets = [0, 64], sizes = [2, 32], strides = [1, 1]} : vector<2x128xf32> to vector<2x32xf32>
    %109 = math.tanh %108 : vector<2x32xf32>
    %110 = vector.extract_strided_slice %95 {offsets = [0, 96], sizes = [2, 32], strides = [1, 1]} : vector<2x128xf32> to vector<2x32xf32>
    %111 = arith.negf %110 : vector<2x32xf32>
    %112 = math.exp %111 : vector<2x32xf32>
    %cst_24 = arith.constant 1.000000e+00 : f32
    %113 = vector.broadcast %cst_24 : f32 to vector<2x32xf32>
    %114 = arith.addf %113, %112 : vector<2x32xf32>
    %115 = arith.divf %113, %114 : vector<2x32xf32>
    %116 = arith.mulf %107, %90 : vector<2x32xf32>
    %117 = arith.mulf %101, %109 : vector<2x32xf32>
    %118 = arith.addf %116, %117 : vector<2x32xf32>
    %119 = math.tanh %118 : vector<2x32xf32>
    %120 = arith.mulf %115, %119 : vector<2x32xf32>
    %121 = vector.extract_strided_slice %5 {offsets = [8, 0], sizes = [2, 128], strides = [1, 1]} : vector<16x128xf32> to vector<2x128xf32>
    %cst_25 = arith.constant dense<0.000000e+00> : vector<2x128xf32>
    %122 = tpu.matmul %120, %6, %cst_25 {dimension_numbers = #tpu.dot_dimension_numbers<[1], [0], [0], [1], [0, 0, 1, 1], [], []>} : vector<2x32xf32>, vector<32x128xf32>, vector<2x128xf32> -> vector<2x128xf32>
    %123 = arith.addf %121, %122 : vector<2x128xf32>
    %124 = vector.extract_strided_slice %123 {offsets = [0, 0], sizes = [2, 32], strides = [1, 1]} : vector<2x128xf32> to vector<2x32xf32>
    %125 = arith.negf %124 : vector<2x32xf32>
    %126 = math.exp %125 : vector<2x32xf32>
    %cst_26 = arith.constant 1.000000e+00 : f32
    %127 = vector.broadcast %cst_26 : f32 to vector<2x32xf32>
    %128 = arith.addf %127, %126 : vector<2x32xf32>
    %129 = arith.divf %127, %128 : vector<2x32xf32>
    %130 = vector.extract_strided_slice %123 {offsets = [0, 32], sizes = [2, 32], strides = [1, 1]} : vector<2x128xf32> to vector<2x32xf32>
    %131 = arith.negf %130 : vector<2x32xf32>
    %132 = math.exp %131 : vector<2x32xf32>
    %cst_27 = arith.constant 1.000000e+00 : f32
    %133 = vector.broadcast %cst_27 : f32 to vector<2x32xf32>
    %134 = arith.addf %133, %132 : vector<2x32xf32>
    %135 = arith.divf %133, %134 : vector<2x32xf32>
    %136 = vector.extract_strided_slice %123 {offsets = [0, 64], sizes = [2, 32], strides = [1, 1]} : vector<2x128xf32> to vector<2x32xf32>
    %137 = math.tanh %136 : vector<2x32xf32>
    %138 = vector.extract_strided_slice %123 {offsets = [0, 96], sizes = [2, 32], strides = [1, 1]} : vector<2x128xf32> to vector<2x32xf32>
    %139 = arith.negf %138 : vector<2x32xf32>
    %140 = math.exp %139 : vector<2x32xf32>
    %cst_28 = arith.constant 1.000000e+00 : f32
    %141 = vector.broadcast %cst_28 : f32 to vector<2x32xf32>
    %142 = arith.addf %141, %140 : vector<2x32xf32>
    %143 = arith.divf %141, %142 : vector<2x32xf32>
    %144 = arith.mulf %135, %118 : vector<2x32xf32>
    %145 = arith.mulf %129, %137 : vector<2x32xf32>
    %146 = arith.addf %144, %145 : vector<2x32xf32>
    %147 = math.tanh %146 : vector<2x32xf32>
    %148 = arith.mulf %143, %147 : vector<2x32xf32>
    %149 = vector.extract_strided_slice %5 {offsets = [10, 0], sizes = [2, 128], strides = [1, 1]} : vector<16x128xf32> to vector<2x128xf32>
    %cst_29 = arith.constant dense<0.000000e+00> : vector<2x128xf32>
    %150 = tpu.matmul %148, %6, %cst_29 {dimension_numbers = #tpu.dot_dimension_numbers<[1], [0], [0], [1], [0, 0, 1, 1], [], []>} : vector<2x32xf32>, vector<32x128xf32>, vector<2x128xf32> -> vector<2x128xf32>
    %151 = arith.addf %149, %150 : vector<2x128xf32>
    %152 = vector.extract_strided_slice %151 {offsets = [0, 0], sizes = [2, 32], strides = [1, 1]} : vector<2x128xf32> to vector<2x32xf32>
    %153 = arith.negf %152 : vector<2x32xf32>
    %154 = math.exp %153 : vector<2x32xf32>
    %cst_30 = arith.constant 1.000000e+00 : f32
    %155 = vector.broadcast %cst_30 : f32 to vector<2x32xf32>
    %156 = arith.addf %155, %154 : vector<2x32xf32>
    %157 = arith.divf %155, %156 : vector<2x32xf32>
    %158 = vector.extract_strided_slice %151 {offsets = [0, 32], sizes = [2, 32], strides = [1, 1]} : vector<2x128xf32> to vector<2x32xf32>
    %159 = arith.negf %158 : vector<2x32xf32>
    %160 = math.exp %159 : vector<2x32xf32>
    %cst_31 = arith.constant 1.000000e+00 : f32
    %161 = vector.broadcast %cst_31 : f32 to vector<2x32xf32>
    %162 = arith.addf %161, %160 : vector<2x32xf32>
    %163 = arith.divf %161, %162 : vector<2x32xf32>
    %164 = vector.extract_strided_slice %151 {offsets = [0, 64], sizes = [2, 32], strides = [1, 1]} : vector<2x128xf32> to vector<2x32xf32>
    %165 = math.tanh %164 : vector<2x32xf32>
    %166 = vector.extract_strided_slice %151 {offsets = [0, 96], sizes = [2, 32], strides = [1, 1]} : vector<2x128xf32> to vector<2x32xf32>
    %167 = arith.negf %166 : vector<2x32xf32>
    %168 = math.exp %167 : vector<2x32xf32>
    %cst_32 = arith.constant 1.000000e+00 : f32
    %169 = vector.broadcast %cst_32 : f32 to vector<2x32xf32>
    %170 = arith.addf %169, %168 : vector<2x32xf32>
    %171 = arith.divf %169, %170 : vector<2x32xf32>
    %172 = arith.mulf %163, %146 : vector<2x32xf32>
    %173 = arith.mulf %157, %165 : vector<2x32xf32>
    %174 = arith.addf %172, %173 : vector<2x32xf32>
    %175 = math.tanh %174 : vector<2x32xf32>
    %176 = arith.mulf %171, %175 : vector<2x32xf32>
    %177 = vector.extract_strided_slice %5 {offsets = [12, 0], sizes = [2, 128], strides = [1, 1]} : vector<16x128xf32> to vector<2x128xf32>
    %cst_33 = arith.constant dense<0.000000e+00> : vector<2x128xf32>
    %178 = tpu.matmul %176, %6, %cst_33 {dimension_numbers = #tpu.dot_dimension_numbers<[1], [0], [0], [1], [0, 0, 1, 1], [], []>} : vector<2x32xf32>, vector<32x128xf32>, vector<2x128xf32> -> vector<2x128xf32>
    %179 = arith.addf %177, %178 : vector<2x128xf32>
    %180 = vector.extract_strided_slice %179 {offsets = [0, 0], sizes = [2, 32], strides = [1, 1]} : vector<2x128xf32> to vector<2x32xf32>
    %181 = arith.negf %180 : vector<2x32xf32>
    %182 = math.exp %181 : vector<2x32xf32>
    %cst_34 = arith.constant 1.000000e+00 : f32
    %183 = vector.broadcast %cst_34 : f32 to vector<2x32xf32>
    %184 = arith.addf %183, %182 : vector<2x32xf32>
    %185 = arith.divf %183, %184 : vector<2x32xf32>
    %186 = vector.extract_strided_slice %179 {offsets = [0, 32], sizes = [2, 32], strides = [1, 1]} : vector<2x128xf32> to vector<2x32xf32>
    %187 = arith.negf %186 : vector<2x32xf32>
    %188 = math.exp %187 : vector<2x32xf32>
    %cst_35 = arith.constant 1.000000e+00 : f32
    %189 = vector.broadcast %cst_35 : f32 to vector<2x32xf32>
    %190 = arith.addf %189, %188 : vector<2x32xf32>
    %191 = arith.divf %189, %190 : vector<2x32xf32>
    %192 = vector.extract_strided_slice %179 {offsets = [0, 64], sizes = [2, 32], strides = [1, 1]} : vector<2x128xf32> to vector<2x32xf32>
    %193 = math.tanh %192 : vector<2x32xf32>
    %194 = vector.extract_strided_slice %179 {offsets = [0, 96], sizes = [2, 32], strides = [1, 1]} : vector<2x128xf32> to vector<2x32xf32>
    %195 = arith.negf %194 : vector<2x32xf32>
    %196 = math.exp %195 : vector<2x32xf32>
    %cst_36 = arith.constant 1.000000e+00 : f32
    %197 = vector.broadcast %cst_36 : f32 to vector<2x32xf32>
    %198 = arith.addf %197, %196 : vector<2x32xf32>
    %199 = arith.divf %197, %198 : vector<2x32xf32>
    %200 = arith.mulf %191, %174 : vector<2x32xf32>
    %201 = arith.mulf %185, %193 : vector<2x32xf32>
    %202 = arith.addf %200, %201 : vector<2x32xf32>
    %203 = math.tanh %202 : vector<2x32xf32>
    %204 = arith.mulf %199, %203 : vector<2x32xf32>
    %205 = vector.extract_strided_slice %5 {offsets = [14, 0], sizes = [2, 128], strides = [1, 1]} : vector<16x128xf32> to vector<2x128xf32>
    %cst_37 = arith.constant dense<0.000000e+00> : vector<2x128xf32>
    %206 = tpu.matmul %204, %6, %cst_37 {dimension_numbers = #tpu.dot_dimension_numbers<[1], [0], [0], [1], [0, 0, 1, 1], [], []>} : vector<2x32xf32>, vector<32x128xf32>, vector<2x128xf32> -> vector<2x128xf32>
    %207 = arith.addf %205, %206 : vector<2x128xf32>
    %208 = vector.extract_strided_slice %207 {offsets = [0, 0], sizes = [2, 32], strides = [1, 1]} : vector<2x128xf32> to vector<2x32xf32>
    %209 = arith.negf %208 : vector<2x32xf32>
    %210 = math.exp %209 : vector<2x32xf32>
    %cst_38 = arith.constant 1.000000e+00 : f32
    %211 = vector.broadcast %cst_38 : f32 to vector<2x32xf32>
    %212 = arith.addf %211, %210 : vector<2x32xf32>
    %213 = arith.divf %211, %212 : vector<2x32xf32>
    %214 = vector.extract_strided_slice %207 {offsets = [0, 32], sizes = [2, 32], strides = [1, 1]} : vector<2x128xf32> to vector<2x32xf32>
    %215 = arith.negf %214 : vector<2x32xf32>
    %216 = math.exp %215 : vector<2x32xf32>
    %cst_39 = arith.constant 1.000000e+00 : f32
    %217 = vector.broadcast %cst_39 : f32 to vector<2x32xf32>
    %218 = arith.addf %217, %216 : vector<2x32xf32>
    %219 = arith.divf %217, %218 : vector<2x32xf32>
    %220 = vector.extract_strided_slice %207 {offsets = [0, 64], sizes = [2, 32], strides = [1, 1]} : vector<2x128xf32> to vector<2x32xf32>
    %221 = math.tanh %220 : vector<2x32xf32>
    %222 = vector.extract_strided_slice %207 {offsets = [0, 96], sizes = [2, 32], strides = [1, 1]} : vector<2x128xf32> to vector<2x32xf32>
    %223 = arith.negf %222 : vector<2x32xf32>
    %224 = math.exp %223 : vector<2x32xf32>
    %cst_40 = arith.constant 1.000000e+00 : f32
    %225 = vector.broadcast %cst_40 : f32 to vector<2x32xf32>
    %226 = arith.addf %225, %224 : vector<2x32xf32>
    %227 = arith.divf %225, %226 : vector<2x32xf32>
    %228 = arith.mulf %219, %202 : vector<2x32xf32>
    %229 = arith.mulf %213, %221 : vector<2x32xf32>
    %230 = arith.addf %228, %229 : vector<2x32xf32>
    %231 = math.tanh %230 : vector<2x32xf32>
    %232 = arith.mulf %227, %231 : vector<2x32xf32>
    %c0_41 = arith.constant 0 : index
    %c0_42 = arith.constant 0 : index
    %233 = vector.load %arg1[%c0_41, %c0_42] : memref<14x32xf32, #tpu.memory_space<vmem>>, vector<14x32xf32>
    %cst_43 = arith.constant 0.000000e+00 : f32
    %234 = vector.broadcast %cst_43 : f32 to vector<14x32xf32>
    %235 = arith.maximumf %233, %234 : vector<14x32xf32>
    %c0_44 = arith.constant 0 : index
    %c0_45 = arith.constant 0 : index
    %236 = vector.load %arg5[%c0_44, %c0_45] : memref<32x128xf32, #tpu.memory_space<vmem>>, vector<32x128xf32>
    %cst_46 = arith.constant dense<0.000000e+00> : vector<14x128xf32>
    %237 = tpu.matmul %235, %236, %cst_46 {dimension_numbers = #tpu.dot_dimension_numbers<[1], [0], [0], [1], [0, 0, 1, 1], [], []>} : vector<14x32xf32>, vector<32x128xf32>, vector<14x128xf32> -> vector<14x128xf32>
    %c0_47 = arith.constant 0 : index
    %c0_48 = arith.constant 0 : index
    %238 = vector.load %arg7[%c0_47, %c0_48] : memref<1x128xf32, #tpu.memory_space<vmem>>, vector<1x128xf32>
    %239 = vector.broadcast %238 : vector<1x128xf32> to vector<14x128xf32>
    %240 = arith.addf %237, %239 : vector<14x128xf32>
    %c0_49 = arith.constant 0 : index
    %c0_50 = arith.constant 0 : index
    %241 = vector.load %arg6[%c0_49, %c0_50] : memref<32x128xf32, #tpu.memory_space<vmem>>, vector<32x128xf32>
    %242 = vector.extract_strided_slice %240 {offsets = [0, 0], sizes = [2, 128], strides = [1, 1]} : vector<14x128xf32> to vector<2x128xf32>
    %cst_51 = arith.constant dense<0.000000e+00> : vector<2x128xf32>
    %243 = tpu.matmul %232, %241, %cst_51 {dimension_numbers = #tpu.dot_dimension_numbers<[1], [0], [0], [1], [0, 0, 1, 1], [], []>} : vector<2x32xf32>, vector<32x128xf32>, vector<2x128xf32> -> vector<2x128xf32>
    %244 = arith.addf %242, %243 : vector<2x128xf32>
    %245 = vector.extract_strided_slice %244 {offsets = [0, 0], sizes = [2, 32], strides = [1, 1]} : vector<2x128xf32> to vector<2x32xf32>
    %246 = arith.negf %245 : vector<2x32xf32>
    %247 = math.exp %246 : vector<2x32xf32>
    %cst_52 = arith.constant 1.000000e+00 : f32
    %248 = vector.broadcast %cst_52 : f32 to vector<2x32xf32>
    %249 = arith.addf %248, %247 : vector<2x32xf32>
    %250 = arith.divf %248, %249 : vector<2x32xf32>
    %251 = vector.extract_strided_slice %244 {offsets = [0, 32], sizes = [2, 32], strides = [1, 1]} : vector<2x128xf32> to vector<2x32xf32>
    %252 = arith.negf %251 : vector<2x32xf32>
    %253 = math.exp %252 : vector<2x32xf32>
    %cst_53 = arith.constant 1.000000e+00 : f32
    %254 = vector.broadcast %cst_53 : f32 to vector<2x32xf32>
    %255 = arith.addf %254, %253 : vector<2x32xf32>
    %256 = arith.divf %254, %255 : vector<2x32xf32>
    %257 = vector.extract_strided_slice %244 {offsets = [0, 64], sizes = [2, 32], strides = [1, 1]} : vector<2x128xf32> to vector<2x32xf32>
    %258 = math.tanh %257 : vector<2x32xf32>
    %259 = vector.extract_strided_slice %244 {offsets = [0, 96], sizes = [2, 32], strides = [1, 1]} : vector<2x128xf32> to vector<2x32xf32>
    %260 = arith.negf %259 : vector<2x32xf32>
    %261 = math.exp %260 : vector<2x32xf32>
    %cst_54 = arith.constant 1.000000e+00 : f32
    %262 = vector.broadcast %cst_54 : f32 to vector<2x32xf32>
    %263 = arith.addf %262, %261 : vector<2x32xf32>
    %264 = arith.divf %262, %263 : vector<2x32xf32>
    %265 = arith.mulf %256, %230 : vector<2x32xf32>
    %266 = arith.mulf %250, %258 : vector<2x32xf32>
    %267 = arith.addf %265, %266 : vector<2x32xf32>
    %268 = math.tanh %267 : vector<2x32xf32>
    %269 = arith.mulf %264, %268 : vector<2x32xf32>
    %c0_55 = arith.constant 0 : index
    %c0_56 = arith.constant 0 : index
    %270 = vector.load %arg11[%c0_55, %c0_56] : memref<14x32xf32, #tpu.memory_space<vmem>>, vector<2x32xf32>
    tpu.vector_store %arg11[%c0_55, %c0_56], %269 {strides = array<i32>} : memref<14x32xf32, #tpu.memory_space<vmem>>, vector<2x32xf32>,
    %271 = vector.extract_strided_slice %240 {offsets = [2, 0], sizes = [2, 128], strides = [1, 1]} : vector<14x128xf32> to vector<2x128xf32>
    %cst_57 = arith.constant dense<0.000000e+00> : vector<2x128xf32>
    %272 = tpu.matmul %269, %241, %cst_57 {dimension_numbers = #tpu.dot_dimension_numbers<[1], [0], [0], [1], [0, 0, 1, 1], [], []>} : vector<2x32xf32>, vector<32x128xf32>, vector<2x128xf32> -> vector<2x128xf32>
    %273 = arith.addf %271, %272 : vector<2x128xf32>
    %274 = vector.extract_strided_slice %273 {offsets = [0, 0], sizes = [2, 32], strides = [1, 1]} : vector<2x128xf32> to vector<2x32xf32>
    %275 = arith.negf %274 : vector<2x32xf32>
    %276 = math.exp %275 : vector<2x32xf32>
    %cst_58 = arith.constant 1.000000e+00 : f32
    %277 = vector.broadcast %cst_58 : f32 to vector<2x32xf32>
    %278 = arith.addf %277, %276 : vector<2x32xf32>
    %279 = arith.divf %277, %278 : vector<2x32xf32>
    %280 = vector.extract_strided_slice %273 {offsets = [0, 32], sizes = [2, 32], strides = [1, 1]} : vector<2x128xf32> to vector<2x32xf32>
    %281 = arith.negf %280 : vector<2x32xf32>
    %282 = math.exp %281 : vector<2x32xf32>
    %cst_59 = arith.constant 1.000000e+00 : f32
    %283 = vector.broadcast %cst_59 : f32 to vector<2x32xf32>
    %284 = arith.addf %283, %282 : vector<2x32xf32>
    %285 = arith.divf %283, %284 : vector<2x32xf32>
    %286 = vector.extract_strided_slice %273 {offsets = [0, 64], sizes = [2, 32], strides = [1, 1]} : vector<2x128xf32> to vector<2x32xf32>
    %287 = math.tanh %286 : vector<2x32xf32>
    %288 = vector.extract_strided_slice %273 {offsets = [0, 96], sizes = [2, 32], strides = [1, 1]} : vector<2x128xf32> to vector<2x32xf32>
    %289 = arith.negf %288 : vector<2x32xf32>
    %290 = math.exp %289 : vector<2x32xf32>
    %cst_60 = arith.constant 1.000000e+00 : f32
    %291 = vector.broadcast %cst_60 : f32 to vector<2x32xf32>
    %292 = arith.addf %291, %290 : vector<2x32xf32>
    %293 = arith.divf %291, %292 : vector<2x32xf32>
    %294 = arith.mulf %285, %267 : vector<2x32xf32>
    %295 = arith.mulf %279, %287 : vector<2x32xf32>
    %296 = arith.addf %294, %295 : vector<2x32xf32>
    %297 = math.tanh %296 : vector<2x32xf32>
    %298 = arith.mulf %293, %297 : vector<2x32xf32>
    %c2 = arith.constant 2 : index
    %c0_61 = arith.constant 0 : index
    %299 = vector.load %arg11[%c2, %c0_61] : memref<14x32xf32, #tpu.memory_space<vmem>>, vector<2x32xf32>
    tpu.vector_store %arg11[%c2, %c0_61], %298 {strides = array<i32>} : memref<14x32xf32, #tpu.memory_space<vmem>>, vector<2x32xf32>,
    %300 = vector.extract_strided_slice %240 {offsets = [4, 0], sizes = [2, 128], strides = [1, 1]} : vector<14x128xf32> to vector<2x128xf32>
    %cst_62 = arith.constant dense<0.000000e+00> : vector<2x128xf32>
    %301 = tpu.matmul %298, %241, %cst_62 {dimension_numbers = #tpu.dot_dimension_numbers<[1], [0], [0], [1], [0, 0, 1, 1], [], []>} : vector<2x32xf32>, vector<32x128xf32>, vector<2x128xf32> -> vector<2x128xf32>
    %302 = arith.addf %300, %301 : vector<2x128xf32>
    %303 = vector.extract_strided_slice %302 {offsets = [0, 0], sizes = [2, 32], strides = [1, 1]} : vector<2x128xf32> to vector<2x32xf32>
    %304 = arith.negf %303 : vector<2x32xf32>
    %305 = math.exp %304 : vector<2x32xf32>
    %cst_63 = arith.constant 1.000000e+00 : f32
    %306 = vector.broadcast %cst_63 : f32 to vector<2x32xf32>
    %307 = arith.addf %306, %305 : vector<2x32xf32>
    %308 = arith.divf %306, %307 : vector<2x32xf32>
    %309 = vector.extract_strided_slice %302 {offsets = [0, 32], sizes = [2, 32], strides = [1, 1]} : vector<2x128xf32> to vector<2x32xf32>
    %310 = arith.negf %309 : vector<2x32xf32>
    %311 = math.exp %310 : vector<2x32xf32>
    %cst_64 = arith.constant 1.000000e+00 : f32
    %312 = vector.broadcast %cst_64 : f32 to vector<2x32xf32>
    %313 = arith.addf %312, %311 : vector<2x32xf32>
    %314 = arith.divf %312, %313 : vector<2x32xf32>
    %315 = vector.extract_strided_slice %302 {offsets = [0, 64], sizes = [2, 32], strides = [1, 1]} : vector<2x128xf32> to vector<2x32xf32>
    %316 = math.tanh %315 : vector<2x32xf32>
    %317 = vector.extract_strided_slice %302 {offsets = [0, 96], sizes = [2, 32], strides = [1, 1]} : vector<2x128xf32> to vector<2x32xf32>
    %318 = arith.negf %317 : vector<2x32xf32>
    %319 = math.exp %318 : vector<2x32xf32>
    %cst_65 = arith.constant 1.000000e+00 : f32
    %320 = vector.broadcast %cst_65 : f32 to vector<2x32xf32>
    %321 = arith.addf %320, %319 : vector<2x32xf32>
    %322 = arith.divf %320, %321 : vector<2x32xf32>
    %323 = arith.mulf %314, %296 : vector<2x32xf32>
    %324 = arith.mulf %308, %316 : vector<2x32xf32>
    %325 = arith.addf %323, %324 : vector<2x32xf32>
    %326 = math.tanh %325 : vector<2x32xf32>
    %327 = arith.mulf %322, %326 : vector<2x32xf32>
    %c4 = arith.constant 4 : index
    %c0_66 = arith.constant 0 : index
    %328 = vector.load %arg11[%c4, %c0_66] : memref<14x32xf32, #tpu.memory_space<vmem>>, vector<2x32xf32>
    tpu.vector_store %arg11[%c4, %c0_66], %327 {strides = array<i32>} : memref<14x32xf32, #tpu.memory_space<vmem>>, vector<2x32xf32>,
    %329 = vector.extract_strided_slice %240 {offsets = [6, 0], sizes = [2, 128], strides = [1, 1]} : vector<14x128xf32> to vector<2x128xf32>
    %cst_67 = arith.constant dense<0.000000e+00> : vector<2x128xf32>
    %330 = tpu.matmul %327, %241, %cst_67 {dimension_numbers = #tpu.dot_dimension_numbers<[1], [0], [0], [1], [0, 0, 1, 1], [], []>} : vector<2x32xf32>, vector<32x128xf32>, vector<2x128xf32> -> vector<2x128xf32>
    %331 = arith.addf %329, %330 : vector<2x128xf32>
    %332 = vector.extract_strided_slice %331 {offsets = [0, 0], sizes = [2, 32], strides = [1, 1]} : vector<2x128xf32> to vector<2x32xf32>
    %333 = arith.negf %332 : vector<2x32xf32>
    %334 = math.exp %333 : vector<2x32xf32>
    %cst_68 = arith.constant 1.000000e+00 : f32
    %335 = vector.broadcast %cst_68 : f32 to vector<2x32xf32>
    %336 = arith.addf %335, %334 : vector<2x32xf32>
    %337 = arith.divf %335, %336 : vector<2x32xf32>
    %338 = vector.extract_strided_slice %331 {offsets = [0, 32], sizes = [2, 32], strides = [1, 1]} : vector<2x128xf32> to vector<2x32xf32>
    %339 = arith.negf %338 : vector<2x32xf32>
    %340 = math.exp %339 : vector<2x32xf32>
    %cst_69 = arith.constant 1.000000e+00 : f32
    %341 = vector.broadcast %cst_69 : f32 to vector<2x32xf32>
    %342 = arith.addf %341, %340 : vector<2x32xf32>
    %343 = arith.divf %341, %342 : vector<2x32xf32>
    %344 = vector.extract_strided_slice %331 {offsets = [0, 64], sizes = [2, 32], strides = [1, 1]} : vector<2x128xf32> to vector<2x32xf32>
    %345 = math.tanh %344 : vector<2x32xf32>
    %346 = vector.extract_strided_slice %331 {offsets = [0, 96], sizes = [2, 32], strides = [1, 1]} : vector<2x128xf32> to vector<2x32xf32>
    %347 = arith.negf %346 : vector<2x32xf32>
    %348 = math.exp %347 : vector<2x32xf32>
    %cst_70 = arith.constant 1.000000e+00 : f32
    %349 = vector.broadcast %cst_70 : f32 to vector<2x32xf32>
    %350 = arith.addf %349, %348 : vector<2x32xf32>
    %351 = arith.divf %349, %350 : vector<2x32xf32>
    %352 = arith.mulf %343, %325 : vector<2x32xf32>
    %353 = arith.mulf %337, %345 : vector<2x32xf32>
    %354 = arith.addf %352, %353 : vector<2x32xf32>
    %355 = math.tanh %354 : vector<2x32xf32>
    %356 = arith.mulf %351, %355 : vector<2x32xf32>
    %c6 = arith.constant 6 : index
    %c0_71 = arith.constant 0 : index
    %357 = vector.load %arg11[%c6, %c0_71] : memref<14x32xf32, #tpu.memory_space<vmem>>, vector<2x32xf32>
    tpu.vector_store %arg11[%c6, %c0_71], %356 {strides = array<i32>} : memref<14x32xf32, #tpu.memory_space<vmem>>, vector<2x32xf32>,
    %358 = vector.extract_strided_slice %240 {offsets = [8, 0], sizes = [2, 128], strides = [1, 1]} : vector<14x128xf32> to vector<2x128xf32>
    %cst_72 = arith.constant dense<0.000000e+00> : vector<2x128xf32>
    %359 = tpu.matmul %356, %241, %cst_72 {dimension_numbers = #tpu.dot_dimension_numbers<[1], [0], [0], [1], [0, 0, 1, 1], [], []>} : vector<2x32xf32>, vector<32x128xf32>, vector<2x128xf32> -> vector<2x128xf32>
    %360 = arith.addf %358, %359 : vector<2x128xf32>
    %361 = vector.extract_strided_slice %360 {offsets = [0, 0], sizes = [2, 32], strides = [1, 1]} : vector<2x128xf32> to vector<2x32xf32>
    %362 = arith.negf %361 : vector<2x32xf32>
    %363 = math.exp %362 : vector<2x32xf32>
    %cst_73 = arith.constant 1.000000e+00 : f32
    %364 = vector.broadcast %cst_73 : f32 to vector<2x32xf32>
    %365 = arith.addf %364, %363 : vector<2x32xf32>
    %366 = arith.divf %364, %365 : vector<2x32xf32>
    %367 = vector.extract_strided_slice %360 {offsets = [0, 32], sizes = [2, 32], strides = [1, 1]} : vector<2x128xf32> to vector<2x32xf32>
    %368 = arith.negf %367 : vector<2x32xf32>
    %369 = math.exp %368 : vector<2x32xf32>
    %cst_74 = arith.constant 1.000000e+00 : f32
    %370 = vector.broadcast %cst_74 : f32 to vector<2x32xf32>
    %371 = arith.addf %370, %369 : vector<2x32xf32>
    %372 = arith.divf %370, %371 : vector<2x32xf32>
    %373 = vector.extract_strided_slice %360 {offsets = [0, 64], sizes = [2, 32], strides = [1, 1]} : vector<2x128xf32> to vector<2x32xf32>
    %374 = math.tanh %373 : vector<2x32xf32>
    %375 = vector.extract_strided_slice %360 {offsets = [0, 96], sizes = [2, 32], strides = [1, 1]} : vector<2x128xf32> to vector<2x32xf32>
    %376 = arith.negf %375 : vector<2x32xf32>
    %377 = math.exp %376 : vector<2x32xf32>
    %cst_75 = arith.constant 1.000000e+00 : f32
    %378 = vector.broadcast %cst_75 : f32 to vector<2x32xf32>
    %379 = arith.addf %378, %377 : vector<2x32xf32>
    %380 = arith.divf %378, %379 : vector<2x32xf32>
    %381 = arith.mulf %372, %354 : vector<2x32xf32>
    %382 = arith.mulf %366, %374 : vector<2x32xf32>
    %383 = arith.addf %381, %382 : vector<2x32xf32>
    %384 = math.tanh %383 : vector<2x32xf32>
    %385 = arith.mulf %380, %384 : vector<2x32xf32>
    %c8 = arith.constant 8 : index
    %c0_76 = arith.constant 0 : index
    %386 = vector.load %arg11[%c8, %c0_76] : memref<14x32xf32, #tpu.memory_space<vmem>>, vector<2x32xf32>
    tpu.vector_store %arg11[%c8, %c0_76], %385 {strides = array<i32>} : memref<14x32xf32, #tpu.memory_space<vmem>>, vector<2x32xf32>,
    %387 = vector.extract_strided_slice %240 {offsets = [10, 0], sizes = [2, 128], strides = [1, 1]} : vector<14x128xf32> to vector<2x128xf32>
    %cst_77 = arith.constant dense<0.000000e+00> : vector<2x128xf32>
    %388 = tpu.matmul %385, %241, %cst_77 {dimension_numbers = #tpu.dot_dimension_numbers<[1], [0], [0], [1], [0, 0, 1, 1], [], []>} : vector<2x32xf32>, vector<32x128xf32>, vector<2x128xf32> -> vector<2x128xf32>
    %389 = arith.addf %387, %388 : vector<2x128xf32>
    %390 = vector.extract_strided_slice %389 {offsets = [0, 0], sizes = [2, 32], strides = [1, 1]} : vector<2x128xf32> to vector<2x32xf32>
    %391 = arith.negf %390 : vector<2x32xf32>
    %392 = math.exp %391 : vector<2x32xf32>
    %cst_78 = arith.constant 1.000000e+00 : f32
    %393 = vector.broadcast %cst_78 : f32 to vector<2x32xf32>
    %394 = arith.addf %393, %392 : vector<2x32xf32>
    %395 = arith.divf %393, %394 : vector<2x32xf32>
    %396 = vector.extract_strided_slice %389 {offsets = [0, 32], sizes = [2, 32], strides = [1, 1]} : vector<2x128xf32> to vector<2x32xf32>
    %397 = arith.negf %396 : vector<2x32xf32>
    %398 = math.exp %397 : vector<2x32xf32>
    %cst_79 = arith.constant 1.000000e+00 : f32
    %399 = vector.broadcast %cst_79 : f32 to vector<2x32xf32>
    %400 = arith.addf %399, %398 : vector<2x32xf32>
    %401 = arith.divf %399, %400 : vector<2x32xf32>
    %402 = vector.extract_strided_slice %389 {offsets = [0, 64], sizes = [2, 32], strides = [1, 1]} : vector<2x128xf32> to vector<2x32xf32>
    %403 = math.tanh %402 : vector<2x32xf32>
    %404 = vector.extract_strided_slice %389 {offsets = [0, 96], sizes = [2, 32], strides = [1, 1]} : vector<2x128xf32> to vector<2x32xf32>
    %405 = arith.negf %404 : vector<2x32xf32>
    %406 = math.exp %405 : vector<2x32xf32>
    %cst_80 = arith.constant 1.000000e+00 : f32
    %407 = vector.broadcast %cst_80 : f32 to vector<2x32xf32>
    %408 = arith.addf %407, %406 : vector<2x32xf32>
    %409 = arith.divf %407, %408 : vector<2x32xf32>
    %410 = arith.mulf %401, %383 : vector<2x32xf32>
    %411 = arith.mulf %395, %403 : vector<2x32xf32>
    %412 = arith.addf %410, %411 : vector<2x32xf32>
    %413 = math.tanh %412 : vector<2x32xf32>
    %414 = arith.mulf %409, %413 : vector<2x32xf32>
    %c10 = arith.constant 10 : index
    %c0_81 = arith.constant 0 : index
    %415 = vector.load %arg11[%c10, %c0_81] : memref<14x32xf32, #tpu.memory_space<vmem>>, vector<2x32xf32>
    tpu.vector_store %arg11[%c10, %c0_81], %414 {strides = array<i32>} : memref<14x32xf32, #tpu.memory_space<vmem>>, vector<2x32xf32>,
    %416 = vector.extract_strided_slice %240 {offsets = [12, 0], sizes = [2, 128], strides = [1, 1]} : vector<14x128xf32> to vector<2x128xf32>
    %cst_82 = arith.constant dense<0.000000e+00> : vector<2x128xf32>
    %417 = tpu.matmul %414, %241, %cst_82 {dimension_numbers = #tpu.dot_dimension_numbers<[1], [0], [0], [1], [0, 0, 1, 1], [], []>} : vector<2x32xf32>, vector<32x128xf32>, vector<2x128xf32> -> vector<2x128xf32>
    %418 = arith.addf %416, %417 : vector<2x128xf32>
    %419 = vector.extract_strided_slice %418 {offsets = [0, 0], sizes = [2, 32], strides = [1, 1]} : vector<2x128xf32> to vector<2x32xf32>
    %420 = arith.negf %419 : vector<2x32xf32>
    %421 = math.exp %420 : vector<2x32xf32>
    %cst_83 = arith.constant 1.000000e+00 : f32
    %422 = vector.broadcast %cst_83 : f32 to vector<2x32xf32>
    %423 = arith.addf %422, %421 : vector<2x32xf32>
    %424 = arith.divf %422, %423 : vector<2x32xf32>
    %425 = vector.extract_strided_slice %418 {offsets = [0, 32], sizes = [2, 32], strides = [1, 1]} : vector<2x128xf32> to vector<2x32xf32>
    %426 = arith.negf %425 : vector<2x32xf32>
    %427 = math.exp %426 : vector<2x32xf32>
    %cst_84 = arith.constant 1.000000e+00 : f32
    %428 = vector.broadcast %cst_84 : f32 to vector<2x32xf32>
    %429 = arith.addf %428, %427 : vector<2x32xf32>
    %430 = arith.divf %428, %429 : vector<2x32xf32>
    %431 = vector.extract_strided_slice %418 {offsets = [0, 64], sizes = [2, 32], strides = [1, 1]} : vector<2x128xf32> to vector<2x32xf32>
    %432 = math.tanh %431 : vector<2x32xf32>
    %433 = vector.extract_strided_slice %418 {offsets = [0, 96], sizes = [2, 32], strides = [1, 1]} : vector<2x128xf32> to vector<2x32xf32>
    %434 = arith.negf %433 : vector<2x32xf32>
    %435 = math.exp %434 : vector<2x32xf32>
    %cst_85 = arith.constant 1.000000e+00 : f32
    %436 = vector.broadcast %cst_85 : f32 to vector<2x32xf32>
    %437 = arith.addf %436, %435 : vector<2x32xf32>
    %438 = arith.divf %436, %437 : vector<2x32xf32>
    %439 = arith.mulf %430, %412 : vector<2x32xf32>
    %440 = arith.mulf %424, %432 : vector<2x32xf32>
    %441 = arith.addf %439, %440 : vector<2x32xf32>
    %442 = math.tanh %441 : vector<2x32xf32>
    %443 = arith.mulf %438, %442 : vector<2x32xf32>
    %c12 = arith.constant 12 : index
    %c0_86 = arith.constant 0 : index
    %444 = vector.load %arg11[%c12, %c0_86] : memref<14x32xf32, #tpu.memory_space<vmem>>, vector<2x32xf32>
    tpu.vector_store %arg11[%c12, %c0_86], %443 {strides = array<i32>} : memref<14x32xf32, #tpu.memory_space<vmem>>, vector<2x32xf32>,
    %c0_87 = arith.constant 0 : index
    %c0_88 = arith.constant 0 : index
    %445 = vector.load %arg11[%c0_87, %c0_88] : memref<14x32xf32, #tpu.memory_space<vmem>>, vector<14x32xf32>
    %c0_89 = arith.constant 0 : index
    %c0_90 = arith.constant 0 : index
    %446 = vector.load %arg8[%c0_89, %c0_90] : memref<32x7xf32, #tpu.memory_space<vmem>>, vector<32x7xf32>
    %cst_91 = arith.constant dense<0.000000e+00> : vector<14x7xf32>
    %447 = tpu.matmul %445, %446, %cst_91 {dimension_numbers = #tpu.dot_dimension_numbers<[1], [0], [0], [1], [0, 0, 1, 1], [], []>} : vector<14x32xf32>, vector<32x7xf32>, vector<14x7xf32> -> vector<14x7xf32>
    %c0_92 = arith.constant 0 : index
    %c0_93 = arith.constant 0 : index
    %448 = vector.load %arg9[%c0_92, %c0_93] : memref<1x7xf32, #tpu.memory_space<vmem>>, vector<1x7xf32>
    %449 = vector.broadcast %448 : vector<1x7xf32> to vector<14x7xf32>
    %450 = arith.addf %447, %449 : vector<14x7xf32>
    %cst_94 = arith.constant dense<0xFF800000> : vector<14xf32>
    %451 = vector.multi_reduction <maximumf>, %450, %cst_94 [1] : vector<14x7xf32> to vector<14xf32>
    %452 = vector.shape_cast %451 : vector<14xf32> to vector<14x1xf32>
    %453 = vector.broadcast %452 : vector<14x1xf32> to vector<14x7xf32>
    %454 = arith.subf %450, %453 : vector<14x7xf32>
    %455 = math.exp %454 : vector<14x7xf32>
    %cst_95 = arith.constant dense<0.000000e+00> : vector<14xf32>
    %456 = vector.multi_reduction <add>, %455, %cst_95 [1] : vector<14x7xf32> to vector<14xf32>
    %457 = vector.shape_cast %456 : vector<14xf32> to vector<14x1xf32>
    %458 = math.log %457 : vector<14x1xf32>
    %459 = arith.addf %458, %452 : vector<14x1xf32>
    %460 = vector.broadcast %459 : vector<14x1xf32> to vector<14x7xf32>
    %461 = arith.subf %450, %460 : vector<14x7xf32>
    %c0_96 = arith.constant 0 : index
    %c0_97 = arith.constant 0 : index
    %462 = vector.load %arg10[%c0_96, %c0_97] : memref<14x7xf32, #tpu.memory_space<vmem>>, vector<14x7xf32>
    tpu.vector_store %arg10[%c0_96, %c0_97], %461 {strides = array<i32>} : memref<14x7xf32, #tpu.memory_space<vmem>>, vector<14x7xf32>,
    return
  }
}

</mosaic_0001>

<bundles_post_ra>
// kernel: seq2seq_lstm_merge_forward.1
= control target key start
LH: loop header
LB: loop body
LE: loop exit
PB: predicated region body
PF: predicated region fallthrough
CT: control target
= control target key end

     0   :  { %vm45_vm0 = vcmask 261120   ;;  %v1423_v9 = vmov 0.0   ;;  %s1424_s11 = smov 64   ;;  %s1709_s2 = inlined_call_operand.vmem [shape: f32[32,128], index: 2, kind: input, shape index: {}]   ;;  %s1710_s3 = inlined_call_operand.vmem [shape: f32[32,128], index: 3, kind: input, shape index: {}]   ;;  %s1711_s0 = inlined_call_operand.vmem [shape: f32[16,32], index: 0, kind: input, shape index: {}]   ;;  %s1712_s4 = inlined_call_operand.vmem [shape: f32[1,128], index: 4, kind: input, shape index: {}]   ;;  %s1713_s5 = inlined_call_operand.vmem [shape: f32[32,128], index: 5, kind: input, shape index: {}]   ;;  %s1714_s6 = inlined_call_operand.vmem [shape: f32[32,128], index: 6, kind: input, shape index: {}]   ;;  %s1715_s1 = inlined_call_operand.vmem [shape: f32[14,32], index: 1, kind: input, shape index: {}]   ;;  %s1716_s7 = inlined_call_operand.vmem [shape: f32[1,128], index: 7, kind: input, shape index: {}]   ;;  %s1717_s8 = inlined_call_operand.vmem [shape: f32[32,7], index: 8, kind: input, shape index: {}]   ;;  %s1718_s9 = inlined_call_operand.vmem [shape: f32[1,7], index: 9, kind: input, shape index: {}]   ;;  %s1719_s10 = inlined_call_operand.vmem [shape: f32[14,7], index: 10, kind: output, shape index: {}]  }
   0x1   :  { %v40_v0 = vld [vmem:[%s1709_s2 + $0x18] sm:$0xff]  ;;  %v39_v1 = vld [vmem:[%s1709_s2 + $0x10] sm:$0xff]  ;;  %v38_v4 = vld [vmem:[%s1709_s2 + $0x8] sm:$0xff] }
   0x2   :  { %v78_v2 = vld [vmem:[%s1710_s3 + $0x18] sm:$0xff]  ;;  %64 = vmatpush.msra.mxu0 %v40_v0  ;;  %v77_v3 = vld [vmem:[%s1710_s3 + $0x10] sm:$0xff]  ;;  %v76_v5 = vld [vmem:[%s1710_s3 + $0x8] sm:$0xff] }
   0x3   :  { %94 = vmatpush.msra.mxu1 %v78_v2  ;;  %157 = vmatpush.msra.mxu2 %v78_v2  ;;  %v37_v6 = vld [vmem:[%s1709_s2] sm:$0xff] }
   0x4   :  { %227 = vmatpush.msra.mxu3 %v78_v2  ;;  %65 = vmatpush.msra.mxu0 %v39_v1  ;;  %v75_v7 = vld [vmem:[%s1710_s3] sm:$0xff] }
   0x5   :  { %95 = vmatpush.msra.mxu1 %v77_v3  ;;  %158 = vmatpush.msra.mxu2 %v77_v3  ;;  %v35_v8 = vld [vmem:[%s1711_s0] sm:$0xff] }
   0x6   :  { %228 = vmatpush.msra.mxu3 %v77_v3  ;;  %66 = vmatpush.msra.mxu0 %v38_v4  ;;  %v1512_v10 = vld [vmem:[%s1712_s4] ss:$0 sm:$0xff]  ;;  %s1425_s4 = smov 32  }
   0x7   :  { %96 = vmatpush.msra.mxu1 %v76_v5  ;;  %159 = vmatpush.msra.mxu2 %v76_v5 }
   0x8   :  { %229 = vmatpush.msra.mxu3 %v76_v5  ;;  %67 = vmatpush.msra.mxu0 %v37_v6 }
   0x9   :  { %97 = vmatpush.msra.mxu1 %v75_v7  ;;  %1254 = vmatmul.msk.f32.vlgmr.msra.gmra.mxu0 %vm45_vm0, %v35_v8 }
   0xa   :  { %98 = vmatmul.f32.vlgmr.msra.gmra.mxu1 %v1423_v9  ;;  %160 = vmatpush.msra.mxu2 %v75_v7 }
   0xb   :  { %230 = vmatpush.msra.mxu3 %v75_v7  ;;  %297 = vmatpush.msrb.mxu1 %v78_v2 }
   0xc   :  { %367 = vmatpush.msrb.mxu2 %v78_v2  ;;  %503 = vmatpush.msrb.mxu0 %v78_v2 }
   0xd   :  { %433 = vmatpush.msrb.mxu3 %v78_v2  ;;  %298 = vmatpush.msrb.mxu1 %v77_v3 }
   0xe   :  { %368 = vmatpush.msrb.mxu2 %v77_v3  ;;  %504 = vmatpush.msrb.mxu0 %v77_v3 }
   0xf   :  { %434 = vmatpush.msrb.mxu3 %v77_v3  ;;  %299 = vmatpush.msrb.mxu1 %v76_v5 }
  0x10   :  { %369 = vmatpush.msrb.mxu2 %v76_v5  ;;  %505 = vmatpush.msrb.mxu0 %v76_v5 }
  0x11   :  { %435 = vmatpush.msrb.mxu3 %v76_v5  ;;  %300 = vmatpush.msrb.mxu1 %v75_v7 }
  0x12   :  { %370 = vmatpush.msrb.mxu2 %v75_v7  ;;  %506 = vmatpush.msrb.mxu0 %v75_v7 }
  0x13   :  { %436 = vmatpush.msrb.mxu3 %v75_v7  ;;  %573 = vmatpush.msra.mxu1 %v78_v2 }
  0x15   :  { %574 = vmatpush.msra.mxu1 %v77_v3 }
  0x17   :  { %575 = vmatpush.msra.mxu1 %v76_v5 }
  0x19   :  { %576 = vmatpush.msra.mxu1 %v75_v7 }
  0x86   :  { %v69_v11 = vpop.f32.mrf.mxu0 }
  0x87   :  { %v99_v12 = vpop.f32.mrf.mxu1  ;;  %v1515_v13 = vadd.f32 %v1512_v10, %v69_v11 }
  0x89   :  { %v102_v14 = vadd.f32 %v99_v12, %v1515_v13 }
  0x8b   :  { %1295 = vtanh.f32 %v102_v14  ;;  %v1256_v16 = vmul.f32 -1.442695, %v102_v14 }
  0x8d   :  { %1297 = vpow2.f32 %v1256_v16 }
  0x91   :  { %v1296_v15 = vpop.eup %1295 }
  0x92   :  { %125 = vrot.lane.b32.xlu0 %v1296_v15, %s1424_s11 }
  0x93   :  { %v1298_v17 = vpop.eup %1297 }
  0x94   :  { %v106_v18 = vadd.f32 1.0, %v1298_v17 }
  0x96   :  { %1299 = vrcp.f32 %v106_v18  ;;  %v118_v24 = vand.u32 2147483648, %v106_v18  ;;  %vm112_vm2 = vweird.f32 %v106_v18  ;;  %v116_v25 = vand.u32 2147483647, %v106_v18 }
  0x98   :  { %v119_v27 = vor.u32 1.1754944e-38, %v118_v24  ;;  %vm117_vm4 = vcmp.eq.f32.partialorder %v116_v25, 8.507059e+37 }
  0x9c   :  { %v1300_v19 = vpop.eup %1299 }
  0x9d   :  { %v108_v20 = vmul.f32 %v1300_v19, %v106_v18  ;;  %vm113_vm1 = vweird.f32 %v1300_v19 }
  0x9e   :  { %vm114_vm3 = vmor %vm112_vm2, %vm113_vm1 }
  0x9f   :  { %v109_v21 = vsub.f32 1.0, %v108_v20 }
  0xa1   :  { %v110_v22 = vmul.f32 %v1300_v19, %v109_v21 }
  0xa3   :  { %v111_v23 = vadd.f32 %v1300_v19, %v110_v22 }
  0xa5   :  { %v115_v26 = vsel %vm114_vm3, %v1300_v19, %v111_v23 }
  0xa6   :  { %v120_v29 = vsel %vm117_vm4, %v119_v27, %v115_v26 }
  0xa7   :  { %v123_v31 = vmul.f32 0.0, %v120_v29 }
 0x104   :  { %v126_v28 = vpop.permute.xlu0 %125 }
 0x105   :  { %v128_v30 = vmul.f32 %v126_v28, %v120_v29 }
 0x107   :  { %130 = vrot.lane.b32.xlu0 %v128_v30, %s1425_s4 }
 0x179   :  { %v131_v32 = vpop.permute.xlu0 %130 }
 0x17a   :  { %v133_v33 = vadd.f32 %v131_v32, %v123_v31 }
 0x17c   :  { %1301 = vtanh.f32 %v133_v33  ;;  %v190_v57 = vrot.slane %v133_v33, 6 }
 0x182   :  { %v1302_v34 = vpop.eup %1301 }
 0x183   :  { %136 = vrot.lane.b32.xlu1 %v1302_v34, %s1424_s11 }
 0x1f5   :  { %v137_v35 = vpop.permute.xlu1 %136 }
 0x1f6   :  { %v139_v36 = vmul.f32 %v137_v35, %v120_v29 }
 0x1f8   :  { %141 = vrot.lane.b32.xlu1 %v139_v36, %s1425_s4 }
 0x26a   :  { %v142_v37 = vpop.permute.xlu1 %141 }
 0x26b   :  { %1257 = vmatmul.msk.f32.vlgmr.msra.gmra.mxu2 %vm45_vm0, %v142_v37 }
 0x2ee   :  { %v162_v38 = vpop.f32.mrf.mxu2 }
 0x2ef   :  { %v166_v39 = vrot.slane %v162_v38, 6 }
 0x2f1   :  { %v168_v40 = vadd.f32 %v166_v39, %v1515_v13 }
 0x2f3   :  { %1303 = vtanh.f32 %v168_v40  ;;  %v1258_v42 = vmul.f32 -1.442695, %v168_v40 }
 0x2f5   :  { %1305 = vpow2.f32 %v1258_v42 }
 0x2f9   :  { %v1304_v41 = vpop.eup %1303 }
 0x2fa   :  { %194 = vrot.lane.b32.xlu2 %v1304_v41, %s1424_s11 }
 0x2fb   :  { %v1306_v43 = vpop.eup %1305 }
 0x2fc   :  { %v172_v44 = vadd.f32 1.0, %v1306_v43 }
 0x2fe   :  { %1307 = vrcp.f32 %v172_v44  ;;  %v184_v50 = vand.u32 2147483648, %v172_v44  ;;  %vm178_vm6 = vweird.f32 %v172_v44  ;;  %v182_v51 = vand.u32 2147483647, %v172_v44 }
 0x300   :  { %v185_v53 = vor.u32 1.1754944e-38, %v184_v50  ;;  %vm183_vm8 = vcmp.eq.f32.partialorder %v182_v51, 8.507059e+37 }
 0x304   :  { %v1308_v45 = vpop.eup %1307 }
 0x305   :  { %v174_v46 = vmul.f32 %v1308_v45, %v172_v44  ;;  %vm179_vm5 = vweird.f32 %v1308_v45 }
 0x306   :  { %vm180_vm7 = vmor %vm178_vm6, %vm179_vm5 }
 0x307   :  { %v175_v47 = vsub.f32 1.0, %v174_v46 }
 0x309   :  { %v176_v48 = vmul.f32 %v1308_v45, %v175_v47 }
 0x30b   :  { %v177_v49 = vadd.f32 %v1308_v45, %v176_v48 }
 0x30d   :  { %v181_v52 = vsel %vm180_vm7, %v1308_v45, %v177_v49 }
 0x30e   :  { %v186_v55 = vsel %vm183_vm8, %v185_v53, %v181_v52 }
 0x30f   :  { %v192_v58 = vmul.f32 %v190_v57, %v186_v55 }
 0x354   :  { %v195_v54 = vpop.permute.xlu2 %194 }
 0x355   :  { %v197_v56 = vmul.f32 %v195_v54, %v186_v55 }
 0x357   :  { %199 = vrot.lane.b32.xlu2 %v197_v56, %s1425_s4 }
 0x3b1   :  { %v200_v59 = vpop.permute.xlu2 %199 }
 0x3b2   :  { %v202_v60 = vadd.f32 %v200_v59, %v192_v58  ;;  %v36_v58 = vld [vmem:[%s1711_s0 + $0x8] sm:$0xff] }
 0x3b3   :  { %1255 = vmatmul.msk.f32.gmra.mxu0 %vm45_vm0, %v36_v58 }
 0x3b4   :  { %1309 = vtanh.f32 %v202_v60  ;;  %v260_v23 = vrot.slane %v202_v60, 6 }
 0x3ba   :  { %v1310_v61 = vpop.eup %1309 }
 0x3bb   :  { %205 = vrot.lane.b32.xlu0 %v1310_v61, %s1424_s11 }
 0x42d   :  { %v206_v62 = vpop.permute.xlu0 %205 }
 0x42e   :  { %v208_v63 = vmul.f32 %v206_v62, %v186_v55 }
 0x430   :  { %v210_v0 = vrot.slane %v208_v63, 2  ;;  %v72_v60 = vpop.f32.mrf.mxu0 }
 0x431   :  { %v1546_v61 = vadd.f32 %v1512_v10, %v72_v60 }
 0x432   :  { %211 = vrot.lane.b32.xlu1 %v210_v0, %s1425_s4 }
 0x4a4   :  { %v212_v1 = vpop.permute.xlu1 %211 }
 0x4a5   :  { %1259 = vmatmul.msk.f32.vlgmr.msra.gmra.mxu3 %vm45_vm0, %v212_v1 }
 0x528   :  { %v232_v2 = vpop.f32.mrf.mxu3 }
 0x529   :  { %v236_v3 = vrot.slane %v232_v2, 4 }
 0x52b   :  { %v238_v4 = vadd.f32 %v236_v3, %v1515_v13 }
 0x52d   :  { %1311 = vtanh.f32 %v238_v4  ;;  %v1260_v6 = vmul.f32 -1.442695, %v238_v4 }
 0x52f   :  { %1313 = vpow2.f32 %v1260_v6 }
 0x533   :  { %v1312_v5 = vpop.eup %1311 }
 0x534   :  { %264 = vrot.lane.b32.xlu2 %v1312_v5, %s1424_s11 }
 0x535   :  { %v1314_v7 = vpop.eup %1313 }
 0x536   :  { %v242_v8 = vadd.f32 1.0, %v1314_v7 }
 0x538   :  { %1315 = vrcp.f32 %v242_v8  ;;  %v254_v16 = vand.u32 2147483648, %v242_v8  ;;  %vm248_vm10 = vweird.f32 %v242_v8  ;;  %v252_v17 = vand.u32 2147483647, %v242_v8 }
 0x53a   :  { %v255_v19 = vor.u32 1.1754944e-38, %v254_v16  ;;  %vm253_vm12 = vcmp.eq.f32.partialorder %v252_v17, 8.507059e+37 }
 0x53e   :  { %v1316_v9 = vpop.eup %1315 }
 0x53f   :  { %v244_v11 = vmul.f32 %v1316_v9, %v242_v8  ;;  %vm249_vm9 = vweird.f32 %v1316_v9 }
 0x540   :  { %vm250_vm11 = vmor %vm248_vm10, %vm249_vm9 }
 0x541   :  { %v245_v12 = vsub.f32 1.0, %v244_v11 }
 0x543   :  { %v246_v14 = vmul.f32 %v1316_v9, %v245_v12 }
 0x545   :  { %v247_v15 = vadd.f32 %v1316_v9, %v246_v14 }
 0x547   :  { %v251_v18 = vsel %vm250_vm11, %v1316_v9, %v247_v15 }
 0x548   :  { %v256_v21 = vsel %vm253_vm12, %v255_v19, %v251_v18 }
 0x549   :  { %v262_v24 = vmul.f32 %v260_v23, %v256_v21 }
 0x58e   :  { %v265_v20 = vpop.permute.xlu2 %264 }
 0x58f   :  { %v267_v22 = vmul.f32 %v265_v20, %v256_v21 }
 0x591   :  { %269 = vrot.lane.b32.xlu0 %v267_v22, %s1425_s4 }
 0x603   :  { %v270_v25 = vpop.permute.xlu0 %269 }
 0x604   :  { %v272_v26 = vadd.f32 %v270_v25, %v262_v24 }
 0x606   :  { %1317 = vtanh.f32 %v272_v26  ;;  %v330_v50 = vrot.slane %v272_v26, 6 }
 0x60c   :  { %v1318_v27 = vpop.eup %1317 }
 0x60d   :  { %275 = vrot.lane.b32.xlu1 %v1318_v27, %s1424_s11 }
 0x67f   :  { %v276_v28 = vpop.permute.xlu1 %275 }
 0x680   :  { %v278_v29 = vmul.f32 %v276_v28, %v256_v21 }
 0x682   :  { %v280_v30 = vrot.slane %v278_v29, 4 }
 0x684   :  { %281 = vrot.lane.b32.xlu2 %v280_v30, %s1425_s4 }
 0x6de   :  { %v282_v31 = vpop.permute.xlu2 %281 }
 0x6df   :  { %1261 = vmatmul.msk.f32.vlgmr.msrb.gmra.mxu1 %vm45_vm0, %v282_v31 }
 0x75c   :  { %v302_v32 = vpop.f32.mrf.mxu1 }
 0x75d   :  { %v306_v33 = vrot.slane %v302_v32, 2 }
 0x75f   :  { %v308_v34 = vadd.f32 %v306_v33, %v1515_v13 }
 0x761   :  { %1319 = vtanh.f32 %v308_v34  ;;  %v1262_v36 = vmul.f32 -1.442695, %v308_v34 }
 0x763   :  { %1321 = vpow2.f32 %v1262_v36 }
 0x767   :  { %v1320_v35 = vpop.eup %1319 }
 0x768   :  { %334 = vrot.lane.b32.xlu0 %v1320_v35, %s1424_s11 }
 0x769   :  { %v1322_v37 = vpop.eup %1321 }
 0x76a   :  { %v312_v38 = vadd.f32 1.0, %v1322_v37 }
 0x76c   :  { %1323 = vrcp.f32 %v312_v38  ;;  %v324_v44 = vand.u32 2147483648, %v312_v38  ;;  %vm318_vm14 = vweird.f32 %v312_v38  ;;  %v322_v45 = vand.u32 2147483647, %v312_v38 }
 0x76e   :  { %v325_v46 = vor.u32 1.1754944e-38, %v324_v44  ;;  %vm323_vm1 = vcmp.eq.f32.partialorder %v322_v45, 8.507059e+37 }
 0x772   :  { %v1324_v39 = vpop.eup %1323 }
 0x773   :  { %v314_v40 = vmul.f32 %v1324_v39, %v312_v38  ;;  %vm319_vm13 = vweird.f32 %v1324_v39 }
 0x774   :  { %vm320_vm15 = vmor %vm318_vm14, %vm319_vm13 }
 0x775   :  { %v315_v41 = vsub.f32 1.0, %v314_v40 }
 0x777   :  { %v316_v42 = vmul.f32 %v1324_v39, %v315_v41 }
 0x779   :  { %v317_v43 = vadd.f32 %v1324_v39, %v316_v42 }
 0x77b   :  { %v321_v13 = vsel %vm320_vm15, %v1324_v39, %v317_v43 }
 0x77c   :  { %v326_v48 = vsel %vm323_vm1, %v325_v46, %v321_v13 }
 0x77d   :  { %v332_v51 = vmul.f32 %v330_v50, %v326_v48 }
 0x7da   :  { %v335_v47 = vpop.permute.xlu0 %334 }
 0x7db   :  { %v337_v49 = vmul.f32 %v335_v47, %v326_v48 }
 0x7dd   :  { %339 = vrot.lane.b32.xlu1 %v337_v49, %s1425_s4 }
 0x84f   :  { %v340_v52 = vpop.permute.xlu1 %339 }
 0x850   :  { %v342_v53 = vadd.f32 %v340_v52, %v332_v51 }
 0x852   :  { %1325 = vtanh.f32 %v342_v53  ;;  %v397_v17 = vrot.slane %v342_v53, 6 }
 0x858   :  { %v1326_v54 = vpop.eup %1325 }
 0x859   :  { %345 = vrot.lane.b32.xlu2 %v1326_v54, %s1424_s11 }
 0x8b3   :  { %v346_v55 = vpop.permute.xlu2 %345 }
 0x8b4   :  { %v348_v56 = vmul.f32 %v346_v55, %v326_v48 }
 0x8b6   :  { %v350_v57 = vrot.slane %v348_v56, 6 }
 0x8b8   :  { %351 = vrot.lane.b32.xlu0 %v350_v57, %s1425_s4 }
 0x92a   :  { %v352_v59 = vpop.permute.xlu0 %351 }
 0x92b   :  { %1263 = vmatmul.msk.f32.vlgmr.msrb.gmra.mxu2 %vm45_vm0, %v352_v59 }
 0x9ae   :  { %v372_v62 = vpop.f32.mrf.mxu2 }
 0x9af   :  { %v375_v63 = vadd.f32 %v372_v62, %v1546_v61 }
 0x9b1   :  { %1327 = vtanh.f32 %v375_v63  ;;  %v1264_v1 = vmul.f32 -1.442695, %v375_v63 }
 0x9b3   :  { %1329 = vpow2.f32 %v1264_v1 }
 0x9b7   :  { %v1328_v0 = vpop.eup %1327 }
 0x9b8   :  { %401 = vrot.lane.b32.xlu1 %v1328_v0, %s1424_s11 }
 0x9b9   :  { %v1330_v2 = vpop.eup %1329 }
 0x9ba   :  { %v379_v3 = vadd.f32 1.0, %v1330_v2 }
 0x9bc   :  { %1331 = vrcp.f32 %v379_v3  ;;  %v391_v10 = vand.u32 2147483648, %v379_v3  ;;  %vm385_vm3 = vweird.f32 %v379_v3  ;;  %v389_v9 = vand.u32 2147483647, %v379_v3 }
 0x9be   :  { %v392_v12 = vor.u32 1.1754944e-38, %v391_v10  ;;  %vm390_vm5 = vcmp.eq.f32.partialorder %v389_v9, 8.507059e+37 }
 0x9c2   :  { %v1332_v4 = vpop.eup %1331 }
 0x9c3   :  { %v381_v5 = vmul.f32 %v1332_v4, %v379_v3  ;;  %vm386_vm2 = vweird.f32 %v1332_v4 }
 0x9c4   :  { %vm387_vm4 = vmor %vm385_vm3, %vm386_vm2 }
 0x9c5   :  { %v382_v6 = vsub.f32 1.0, %v381_v5 }
 0x9c7   :  { %v383_v7 = vmul.f32 %v1332_v4, %v382_v6 }
 0x9c9   :  { %v384_v8 = vadd.f32 %v1332_v4, %v383_v7 }
 0x9cb   :  { %v388_v11 = vsel %vm387_vm4, %v1332_v4, %v384_v8 }
 0x9cc   :  { %v393_v15 = vsel %vm390_vm5, %v392_v12, %v388_v11 }
 0x9cd   :  { %v399_v18 = vmul.f32 %v397_v17, %v393_v15 }
 0xa2a   :  { %v402_v14 = vpop.permute.xlu1 %401 }
 0xa2b   :  { %v404_v16 = vmul.f32 %v402_v14, %v393_v15 }
 0xa2d   :  { %406 = vrot.lane.b32.xlu2 %v404_v16, %s1425_s4 }
 0xa87   :  { %v407_v19 = vpop.permute.xlu2 %406 }
 0xa88   :  { %v409_v20 = vadd.f32 %v407_v19, %v399_v18 }
 0xa8a   :  { %1333 = vtanh.f32 %v409_v20  ;;  %v466_v44 = vrot.slane %v409_v20, 6 }
 0xa90   :  { %v1334_v21 = vpop.eup %1333 }
 0xa91   :  { %412 = vrot.lane.b32.xlu0 %v1334_v21, %s1424_s11 }
 0xb03   :  { %v413_v22 = vpop.permute.xlu0 %412 }
 0xb04   :  { %v415_v23 = vmul.f32 %v413_v22, %v393_v15 }
 0xb06   :  { %417 = vrot.lane.b32.xlu1 %v415_v23, %s1425_s4 }
 0xb78   :  { %v418_v24 = vpop.permute.xlu1 %417 }
 0xb79   :  { %1265 = vmatmul.msk.f32.vlgmr.msrb.gmra.mxu3 %vm45_vm0, %v418_v24 }
 0xbfc   :  { %v438_v25 = vpop.f32.mrf.mxu3 }
 0xbfd   :  { %v442_v26 = vrot.slane %v438_v25, 6 }
 0xbff   :  { %v444_v27 = vadd.f32 %v442_v26, %v1546_v61 }
 0xc01   :  { %1335 = vtanh.f32 %v444_v27  ;;  %v1266_v29 = vmul.f32 -1.442695, %v444_v27 }
 0xc03   :  { %1337 = vpow2.f32 %v1266_v29 }
 0xc07   :  { %v1336_v28 = vpop.eup %1335 }
 0xc08   :  { %470 = vrot.lane.b32.xlu2 %v1336_v28, %s1424_s11 }
 0xc09   :  { %v1338_v30 = vpop.eup %1337 }
 0xc0a   :  { %v448_v31 = vadd.f32 1.0, %v1338_v30 }
 0xc0c   :  { %1339 = vrcp.f32 %v448_v31  ;;  %v460_v37 = vand.u32 2147483648, %v448_v31  ;;  %vm454_vm7 = vweird.f32 %v448_v31  ;;  %v458_v38 = vand.u32 2147483647, %v448_v31 }
 0xc0e   :  { %v461_v40 = vor.u32 1.1754944e-38, %v460_v37  ;;  %vm459_vm9 = vcmp.eq.f32.partialorder %v458_v38, 8.507059e+37 }
 0xc12   :  { %v1340_v32 = vpop.eup %1339 }
 0xc13   :  { %v450_v33 = vmul.f32 %v1340_v32, %v448_v31  ;;  %vm455_vm6 = vweird.f32 %v1340_v32 }
 0xc14   :  { %vm456_vm8 = vmor %vm454_vm7, %vm455_vm6  ;;  %vm741_vm7 = vcmask 254976  }
 0xc15   :  { %v451_v34 = vsub.f32 1.0, %v450_v33 }
 0xc17   :  { %v452_v35 = vmul.f32 %v1340_v32, %v451_v34 }
 0xc19   :  { %v453_v36 = vadd.f32 %v1340_v32, %v452_v35 }
 0xc1b   :  { %v457_v39 = vsel %vm456_vm8, %v1340_v32, %v453_v36 }
 0xc1c   :  { %v462_v42 = vsel %vm459_vm9, %v461_v40, %v457_v39 }
 0xc1d   :  { %v468_v45 = vmul.f32 %v466_v44, %v462_v42  ;;  %v668_v44 = vld [vmem:[%s1714_s6 + $0x10] sm:$0xff] }
 0xc62   :  { %v471_v41 = vpop.permute.xlu2 %470 }
 0xc63   :  { %v473_v43 = vmul.f32 %v471_v41, %v462_v42  ;;  %v632_v41 = vld [vmem:[%s1713_s5 + $0x18] sm:$0xff] }
 0xc64   :  { %655 = vmatpush.msra.mxu2 %v632_v41 }
 0xc65   :  { %475 = vrot.lane.b32.xlu0 %v473_v43, %s1425_s4  ;;  %v669_v43 = vld [vmem:[%s1714_s6 + $0x18] sm:$0xff] }
 0xc66   :  { %688 = vmatpush.msra.mxu3 %v669_v43  ;;  %757 = vmatpush.msra.mxu0 %v669_v43 }
 0xc67   :  { %832 = vmatpush.msrb.mxu1 %v669_v43 }
 0xc68   :  { %689 = vmatpush.msra.mxu3 %v668_v44  ;;  %758 = vmatpush.msra.mxu0 %v668_v44 }
 0xc69   :  { %833 = vmatpush.msrb.mxu1 %v668_v44 }
 0xcd7   :  { %v476_v13 = vpop.permute.xlu0 %475 }
 0xcd8   :  { %v478_v46 = vadd.f32 %v476_v13, %v468_v45  ;;  %v630_v45 = vld [vmem:[%s1713_s5 + $0x8] sm:$0xff] }
 0xcd9   :  { %v667_v13 = vld [vmem:[%s1714_s6 + $0x8] sm:$0xff] }
 0xcda   :  { %1341 = vtanh.f32 %v478_v46  ;;  %v536_v8 = vrot.slane %v478_v46, 6  ;;  %v625_v46 = vld [vmem:[%s1715_s1] sm:$0xff]  ;;  %690 = vmatpush.msra.mxu3 %v667_v13  ;;  %759 = vmatpush.msra.mxu0 %v667_v13 }
 0xcdb   :  { %834 = vmatpush.msrb.mxu1 %v667_v13 }
 0xce0   :  { %v1342_v47 = vpop.eup %1341 }
 0xce1   :  { %481 = vrot.lane.b32.xlu1 %v1342_v47, %s1424_s11  ;;  %v629_v47 = vld [vmem:[%s1713_s5] sm:$0xff] }
 0xd53   :  { %v482_v48 = vpop.permute.xlu1 %481 }
 0xd54   :  { %v484_v49 = vmul.f32 %v482_v48, %v462_v42  ;;  %v631_v42 = vld [vmem:[%s1713_s5 + $0x10] sm:$0xff]  ;;  %v627_v48 = vmax.f32 %v625_v46, 0.0 }
 0xd55   :  { %656 = vmatpush.msra.mxu2 %v631_v42 }
 0xd56   :  { %v486_v50 = vrot.slane %v484_v49, 2  ;;  %v666_v49 = vld [vmem:[%s1714_s6] sm:$0xff] }
 0xd57   :  { %657 = vmatpush.msra.mxu2 %v630_v45  ;;  %691 = vmatpush.msra.mxu3 %v666_v49 }
 0xd58   :  { %487 = vrot.lane.b32.xlu2 %v486_v50, %s1425_s4  ;;  %760 = vmatpush.msra.mxu0 %v666_v49 }
 0xd59   :  { %658 = vmatpush.msra.mxu2 %v629_v47  ;;  %835 = vmatpush.msrb.mxu1 %v666_v49 }
 0xd5a   :  { %1271 = vmatmul.msk.f32.vlgmr.msra.gmra.mxu2 %vm45_vm0, %v627_v48  ;;  %907 = vmatpush.msrb.mxu3 %v669_v43 }
 0xd5b   :  { %1124 = vmatpush.msrb.mxu2 %v669_v43 }
 0xd5c   :  { %908 = vmatpush.msrb.mxu3 %v668_v44 }
 0xd5d   :  { %1125 = vmatpush.msrb.mxu2 %v668_v44 }
 0xd5e   :  { %909 = vmatpush.msrb.mxu3 %v667_v13 }
 0xd5f   :  { %1126 = vmatpush.msrb.mxu2 %v667_v13 }
 0xd60   :  { %910 = vmatpush.msrb.mxu3 %v666_v49 }
 0xd61   :  { %1127 = vmatpush.msrb.mxu2 %v666_v49 }
 0xdb2   :  { %v488_v51 = vpop.permute.xlu2 %487 }
 0xdb3   :  { %1267 = vmatmul.msk.f32.vlgmr.msrb.gmra.mxu0 %vm45_vm0, %v488_v51 }
 0xdb4   :  { %982 = vmatpush.msrb.mxu0 %v669_v43 }
 0xdb6   :  { %983 = vmatpush.msrb.mxu0 %v668_v44 }
 0xdb8   :  { %984 = vmatpush.msrb.mxu0 %v667_v13 }
 0xdba   :  { %985 = vmatpush.msrb.mxu0 %v666_v49 }
 0xe30   :  { %v508_v52 = vpop.f32.mrf.mxu0 }
 0xe31   :  { %v512_v53 = vrot.slane %v508_v52, 4 }
 0xe33   :  { %v514_v54 = vadd.f32 %v512_v53, %v1546_v61 }
 0xe35   :  { %1343 = vtanh.f32 %v514_v54  ;;  %v1268_v56 = vmul.f32 -1.442695, %v514_v54  ;;  %v1606_v54 = vld [vmem:[%s1716_s7] ss:$0 sm:$0xff] }
 0xe37   :  { %1345 = vpow2.f32 %v1268_v56 }
 0xe3b   :  { %v1344_v55 = vpop.eup %1343 }
 0xe3c   :  { %540 = vrot.lane.b32.xlu0 %v1344_v55, %s1424_s11  ;;  %v660_v55 = vpop.f32.mrf.mxu2 }
 0xe3d   :  { %v1346_v57 = vpop.eup %1345  ;;  %v1609_v56 = vadd.f32 %v1606_v54, %v660_v55 }
 0xe3e   :  { %v518_v58 = vadd.f32 1.0, %v1346_v57 }
 0xe40   :  { %1347 = vrcp.f32 %v518_v58  ;;  %v530_v1 = vand.u32 2147483648, %v518_v58  ;;  %vm524_vm11 = vweird.f32 %v518_v58  ;;  %v528_v2 = vand.u32 2147483647, %v518_v58 }
 0xe42   :  { %v531_v4 = vor.u32 1.1754944e-38, %v530_v1  ;;  %vm529_vm13 = vcmp.eq.f32.partialorder %v528_v2, 8.507059e+37 }
 0xe46   :  { %v1348_v59 = vpop.eup %1347 }
 0xe47   :  { %v520_v60 = vmul.f32 %v1348_v59, %v518_v58  ;;  %vm525_vm10 = vweird.f32 %v1348_v59 }
 0xe48   :  { %vm526_vm12 = vmor %vm524_vm11, %vm525_vm10 }
 0xe49   :  { %v521_v62 = vsub.f32 1.0, %v520_v60 }
 0xe4b   :  { %v522_v63 = vmul.f32 %v1348_v59, %v521_v62 }
 0xe4d   :  { %v523_v0 = vadd.f32 %v1348_v59, %v522_v63 }
 0xe4f   :  { %v527_v3 = vsel %vm526_vm12, %v1348_v59, %v523_v0 }
 0xe50   :  { %v532_v6 = vsel %vm529_vm13, %v531_v4, %v527_v3 }
 0xe51   :  { %v538_v10 = vmul.f32 %v536_v8, %v532_v6 }
 0xeae   :  { %v541_v5 = vpop.permute.xlu0 %540 }
 0xeaf   :  { %v543_v7 = vmul.f32 %v541_v5, %v532_v6 }
 0xeb1   :  { %545 = vrot.lane.b32.xlu1 %v543_v7, %s1425_s4 }
 0xf23   :  { %v546_v9 = vpop.permute.xlu1 %545 }
 0xf24   :  { %v548_v11 = vadd.f32 %v546_v9, %v538_v10 }
 0xf26   :  { %1349 = vtanh.f32 %v548_v11  ;;  %v606_v36 = vrot.slane %v548_v11, 6 }
 0xf2c   :  { %v1350_v12 = vpop.eup %1349 }
 0xf2d   :  { %551 = vrot.lane.b32.xlu2 %v1350_v12, %s1424_s11 }
 0xf87   :  { %v552_v14 = vpop.permute.xlu2 %551 }
 0xf88   :  { %v554_v15 = vmul.f32 %v552_v14, %v532_v6 }
 0xf8a   :  { %v556_v16 = vrot.slane %v554_v15, 4 }
 0xf8c   :  { %557 = vrot.lane.b32.xlu0 %v556_v16, %s1425_s4 }
 0xffe   :  { %v558_v17 = vpop.permute.xlu0 %557 }
 0xfff   :  { %1269 = vmatmul.msk.f32.vlgmr.msra.gmra.mxu1 %vm45_vm0, %v558_v17 }
0x1000   :  { %1050 = vmatpush.msra.mxu1 %v669_v43 }
0x1002   :  { %1051 = vmatpush.msra.mxu1 %v668_v44 }
0x1004   :  { %1052 = vmatpush.msra.mxu1 %v667_v13 }
0x1006   :  { %1053 = vmatpush.msra.mxu1 %v666_v49 }
0x107c   :  { %v578_v18 = vpop.f32.mrf.mxu1 }
0x107d   :  { %v582_v19 = vrot.slane %v578_v18, 2 }
0x107f   :  { %v584_v20 = vadd.f32 %v582_v19, %v1546_v61 }
0x1081   :  { %1351 = vtanh.f32 %v584_v20  ;;  %v1270_v22 = vmul.f32 -1.442695, %v584_v20 }
0x1083   :  { %1353 = vpow2.f32 %v1270_v22 }
0x1087   :  { %v1352_v21 = vpop.eup %1351 }
0x1088   :  { %610 = vrot.lane.b32.xlu1 %v1352_v21, %s1424_s11 }
0x1089   :  { %v1354_v23 = vpop.eup %1353 }
0x108a   :  { %v588_v24 = vadd.f32 1.0, %v1354_v23 }
0x108c   :  { %1355 = vrcp.f32 %v588_v24  ;;  %v600_v30 = vand.u32 2147483648, %v588_v24  ;;  %vm594_vm15 = vweird.f32 %v588_v24  ;;  %v598_v31 = vand.u32 2147483647, %v588_v24 }
0x108e   :  { %v601_v32 = vor.u32 1.1754944e-38, %v600_v30  ;;  %vm599_vm2 = vcmp.eq.f32.partialorder %v598_v31, 8.507059e+37 }
0x1092   :  { %v1356_v25 = vpop.eup %1355 }
0x1093   :  { %v590_v26 = vmul.f32 %v1356_v25, %v588_v24  ;;  %vm595_vm14 = vweird.f32 %v1356_v25 }
0x1094   :  { %vm596_vm1 = vmor %vm594_vm15, %vm595_vm14 }
0x1095   :  { %v591_v27 = vsub.f32 1.0, %v590_v26 }
0x1097   :  { %v592_v28 = vmul.f32 %v1356_v25, %v591_v27 }
0x1099   :  { %v593_v29 = vadd.f32 %v1356_v25, %v592_v28 }
0x109b   :  { %v597_v61 = vsel %vm596_vm1, %v1356_v25, %v593_v29 }
0x109c   :  { %v602_v34 = vsel %vm599_vm2, %v601_v32, %v597_v61 }
0x109d   :  { %v608_v37 = vmul.f32 %v606_v36, %v602_v34 }
0x10fa   :  { %v611_v33 = vpop.permute.xlu1 %610 }
0x10fb   :  { %v613_v35 = vmul.f32 %v611_v33, %v602_v34 }
0x10fd   :  { %615 = vrot.lane.b32.xlu2 %v613_v35, %s1425_s4 }
0x1157   :  { %v616_v38 = vpop.permute.xlu2 %615 }
0x1158   :  { %v1569_v39 = vadd.f32 %v616_v38, %v608_v37 }
0x115a   :  { %1357 = vtanh.f32 %v1569_v39  ;;  %v718_v12 = vrot.slane %v1569_v39, 6 }
0x1160   :  { %v1358_v40 = vpop.eup %1357 }
0x1161   :  { %621 = vrot.lane.b32.xlu0 %v1358_v40, %s1424_s11 }
0x11d3   :  { %v622_v50 = vpop.permute.xlu0 %621 }
0x11d4   :  { %v624_v51 = vmul.f32 %v622_v50, %v602_v34 }
0x11d6   :  { %v671_v52 = vrot.slane %v624_v51, 6 }
0x11d8   :  { %672 = vrot.lane.b32.xlu1 %v671_v52, %s1425_s4 }
0x124a   :  { %v673_v53 = vpop.permute.xlu1 %672 }
0x124b   :  { %1273 = vmatmul.msk.f32.vlgmr.msra.gmra.mxu3 %vm45_vm0, %v673_v53 }
0x12ce   :  { %v693_v57 = vpop.f32.mrf.mxu3 }
0x12cf   :  { %v696_v58 = vadd.f32 %v693_v57, %v1609_v56 }
0x12d1   :  { %1359 = vtanh.f32 %v696_v58  ;;  %v1274_v60 = vmul.f32 -1.442695, %v696_v58 }
0x12d3   :  { %1361 = vpow2.f32 %v1274_v60 }
0x12d7   :  { %v1360_v59 = vpop.eup %1359 }
0x12d8   :  { %722 = vrot.lane.b32.xlu2 %v1360_v59, %s1424_s11 }
0x12d9   :  { %v1362_v62 = vpop.eup %1361 }
0x12da   :  { %v700_v63 = vadd.f32 1.0, %v1362_v62 }
0x12dc   :  { %1363 = vrcp.f32 %v700_v63  ;;  %v712_v5 = vand.u32 2147483648, %v700_v63  ;;  %vm706_vm4 = vweird.f32 %v700_v63  ;;  %v710_v6 = vand.u32 2147483647, %v700_v63 }
0x12de   :  { %v713_v8 = vor.u32 1.1754944e-38, %v712_v5  ;;  %vm711_vm6 = vcmp.eq.f32.partialorder %v710_v6, 8.507059e+37 }
0x12e2   :  { %v1364_v0 = vpop.eup %1363 }
0x12e3   :  { %v702_v1 = vmul.f32 %v1364_v0, %v700_v63  ;;  %vm707_vm3 = vweird.f32 %v1364_v0 }
0x12e4   :  { %vm708_vm5 = vmor %vm706_vm4, %vm707_vm3 }
0x12e5   :  { %v703_v2 = vsub.f32 1.0, %v702_v1 }
0x12e7   :  { %v704_v3 = vmul.f32 %v1364_v0, %v703_v2 }
0x12e9   :  { %v705_v4 = vadd.f32 %v1364_v0, %v704_v3 }
0x12eb   :  { %v709_v7 = vsel %vm708_vm5, %v1364_v0, %v705_v4 }
0x12ec   :  { %v714_v9 = vsel %vm711_vm6, %v713_v8, %v709_v7 }
0x12ed   :  { %v720_v14 = vmul.f32 %v718_v12, %v714_v9 }
0x1332   :  { %v723_v10 = vpop.permute.xlu2 %722 }
0x1333   :  { %v725_v11 = vmul.f32 %v723_v10, %v714_v9 }
0x1335   :  { %727 = vrot.lane.b32.xlu0 %v725_v11, %s1425_s4 }
0x13a7   :  { %v728_v15 = vpop.permute.xlu0 %727 }
0x13a8   :  { %v730_v16 = vadd.f32 %v728_v15, %v720_v14 }
0x13aa   :  { %1365 = vtanh.f32 %v730_v16  ;;  %v790_v39 = vrot.slane %v730_v16, 6 }
0x13b0   :  { %v1366_v17 = vpop.eup %1365 }
0x13b1   :  { %733 = vrot.lane.b32.xlu1 %v1366_v17, %s1424_s11 }
0x1423   :  { %v734_v18 = vpop.permute.xlu1 %733 }
0x1424   :  { %v736_v19 = vmul.f32 %v734_v18, %v714_v9 }
0x1426   :  { %738 = vrot.lane.b32.xlu2 %v736_v19, %s1425_s4 }
0x1480   :  { %v739_v20 = vpop.permute.xlu2 %738 }
0x1481   :  { %742 = vst.msk [vmem:[#allocation2] sm:$0x3] %vm741_vm7, %v739_v20  ;;  %1275 = vmatmul.msk.f32.vlgmr.msra.gmra.mxu0 %vm45_vm0, %v739_v20 }
0x14fe   :  { %v762_v21 = vpop.f32.mrf.mxu0 }
0x14ff   :  { %v766_v22 = vrot.slane %v762_v21, 6 }
0x1501   :  { %v768_v23 = vadd.f32 %v766_v22, %v1609_v56 }
0x1503   :  { %1367 = vtanh.f32 %v768_v23  ;;  %v1276_v25 = vmul.f32 -1.442695, %v768_v23 }
0x1505   :  { %1369 = vpow2.f32 %v1276_v25 }
0x1509   :  { %v1368_v24 = vpop.eup %1367 }
0x150a   :  { %794 = vrot.lane.b32.xlu0 %v1368_v24, %s1424_s11 }
0x150b   :  { %v1370_v26 = vpop.eup %1369 }
0x150c   :  { %v772_v27 = vadd.f32 1.0, %v1370_v26 }
0x150e   :  { %1371 = vrcp.f32 %v772_v27  ;;  %v784_v32 = vand.u32 2147483648, %v772_v27  ;;  %vm778_vm9 = vweird.f32 %v772_v27  ;;  %v782_v33 = vand.u32 2147483647, %v772_v27 }
0x1510   :  { %v785_v35 = vor.u32 1.1754944e-38, %v784_v32  ;;  %vm783_vm11 = vcmp.eq.f32.partialorder %v782_v33, 8.507059e+37 }
0x1514   :  { %v1372_v28 = vpop.eup %1371 }
0x1515   :  { %v774_v29 = vmul.f32 %v1372_v28, %v772_v27  ;;  %vm779_vm8 = vweird.f32 %v1372_v28 }
0x1516   :  { %vm780_vm10 = vmor %vm778_vm9, %vm779_vm8 }
0x1517   :  { %v775_v30 = vsub.f32 1.0, %v774_v29 }
0x1519   :  { %v776_v31 = vmul.f32 %v1372_v28, %v775_v30 }
0x151b   :  { %v777_v61 = vadd.f32 %v1372_v28, %v776_v31 }
0x151d   :  { %v781_v34 = vsel %vm780_vm10, %v1372_v28, %v777_v61 }
0x151e   :  { %v786_v37 = vsel %vm783_vm11, %v785_v35, %v781_v34 }
0x151f   :  { %v792_v40 = vmul.f32 %v790_v39, %v786_v37 }
0x157c   :  { %v795_v36 = vpop.permute.xlu0 %794 }
0x157d   :  { %v797_v38 = vmul.f32 %v795_v36, %v786_v37 }
0x157f   :  { %799 = vrot.lane.b32.xlu1 %v797_v38, %s1425_s4 }
0x15f1   :  { %v800_v41 = vpop.permute.xlu1 %799 }
0x15f2   :  { %v802_v42 = vadd.f32 %v800_v41, %v792_v40 }
0x15f4   :  { %1373 = vtanh.f32 %v802_v42  ;;  %v865_v5 = vrot.slane %v802_v42, 6 }
0x15fa   :  { %v1374_v43 = vpop.eup %1373 }
0x15fb   :  { %805 = vrot.lane.b32.xlu2 %v1374_v43, %s1424_s11 }
0x1655   :  { %v806_v44 = vpop.permute.xlu2 %805 }
0x1656   :  { %v1623_v45 = vmul.f32 %v806_v44, %v786_v37  ;;  %v626_v37 = vld [vmem:[%s1715_s1 + $0x8] sm:$0x3f] }
0x1657   :  { %v628_v38 = vmax.f32 %v626_v37, 0.0 }
0x1658   :  { %v815_v13 = vrot.slane %v1623_v45, 2 }
0x1659   :  { %1272 = vmatmul.msk.f32.gmra.mxu2 %vm45_vm0, %v628_v38 }
0x165a   :  { %816 = vrot.lane.b32.xlu0 %v815_v13, %s1425_s4 }
0x16cc   :  { %v817_v46 = vpop.permute.xlu0 %816 }
0x16cd   :  { %1277 = vmatmul.msk.f32.vlgmr.msrb.gmra.mxu1 %vm45_vm0, %v817_v46 }
0x16dc   :  { %v663_v43 = vpop.f32.mrf.mxu2 }
0x16dd   :  { %v1651_v44 = vadd.f32 %v1606_v54, %v663_v43 }
0x174a   :  { %v837_v47 = vpop.f32.mrf.mxu1 }
0x174b   :  { %v841_v48 = vrot.slane %v837_v47, 4 }
0x174d   :  { %v843_v49 = vadd.f32 %v841_v48, %v1609_v56 }
0x174f   :  { %1375 = vtanh.f32 %v843_v49  ;;  %v1278_v51 = vmul.f32 -1.442695, %v843_v49 }
0x1751   :  { %1377 = vpow2.f32 %v1278_v51 }
0x1755   :  { %v1376_v50 = vpop.eup %1375 }
0x1756   :  { %869 = vrot.lane.b32.xlu1 %v1376_v50, %s1424_s11 }
0x1757   :  { %v1378_v52 = vpop.eup %1377 }
0x1758   :  { %v847_v53 = vadd.f32 1.0, %v1378_v52 }
0x175a   :  { %1379 = vrcp.f32 %v847_v53  ;;  %v859_v62 = vand.u32 2147483648, %v847_v53  ;;  %vm853_vm13 = vweird.f32 %v847_v53  ;;  %v857_v63 = vand.u32 2147483647, %v847_v53 }
0x175c   :  { %v860_v1 = vor.u32 1.1754944e-38, %v859_v62  ;;  %vm858_vm15 = vcmp.eq.f32.partialorder %v857_v63, 8.507059e+37 }
0x1760   :  { %v1380_v55 = vpop.eup %1379 }
0x1761   :  { %v849_v57 = vmul.f32 %v1380_v55, %v847_v53  ;;  %vm854_vm12 = vweird.f32 %v1380_v55 }
0x1762   :  { %vm855_vm14 = vmor %vm853_vm13, %vm854_vm12 }
0x1763   :  { %v850_v58 = vsub.f32 1.0, %v849_v57 }
0x1765   :  { %v851_v59 = vmul.f32 %v1380_v55, %v850_v58 }
0x1767   :  { %v852_v60 = vadd.f32 %v1380_v55, %v851_v59 }
0x1769   :  { %v856_v0 = vsel %vm855_vm14, %v1380_v55, %v852_v60 }
0x176a   :  { %v861_v3 = vsel %vm858_vm15, %v860_v1, %v856_v0 }
0x176b   :  { %v867_v6 = vmul.f32 %v865_v5, %v861_v3 }
0x17c8   :  { %v870_v2 = vpop.permute.xlu1 %869 }
0x17c9   :  { %v872_v4 = vmul.f32 %v870_v2, %v861_v3 }
0x17cb   :  { %874 = vrot.lane.b32.xlu2 %v872_v4, %s1425_s4 }
0x1825   :  { %v875_v7 = vpop.permute.xlu2 %874 }
0x1826   :  { %v877_v8 = vadd.f32 %v875_v7, %v867_v6 }
0x1828   :  { %1381 = vtanh.f32 %v877_v8  ;;  %v940_v32 = vrot.slane %v877_v8, 6 }
0x182e   :  { %v1382_v10 = vpop.eup %1381 }
0x182f   :  { %880 = vrot.lane.b32.xlu0 %v1382_v10, %s1424_s11 }
0x18a1   :  { %v881_v9 = vpop.permute.xlu0 %880 }
0x18a2   :  { %v1632_v11 = vmul.f32 %v881_v9, %v861_v3 }
0x18a4   :  { %v890_v12 = vrot.slane %v1632_v11, 4 }
0x18a6   :  { %891 = vrot.lane.b32.xlu1 %v890_v12, %s1425_s4 }
0x1918   :  { %v892_v14 = vpop.permute.xlu1 %891 }
0x1919   :  { %1279 = vmatmul.msk.f32.vlgmr.msrb.gmra.mxu3 %vm45_vm0, %v892_v14 }
0x199c   :  { %v912_v15 = vpop.f32.mrf.mxu3 }
0x199d   :  { %v916_v16 = vrot.slane %v912_v15, 2 }
0x199f   :  { %v918_v17 = vadd.f32 %v916_v16, %v1609_v56 }
0x19a1   :  { %1383 = vtanh.f32 %v918_v17  ;;  %v1280_v19 = vmul.f32 -1.442695, %v918_v17 }
0x19a3   :  { %1385 = vpow2.f32 %v1280_v19 }
0x19a7   :  { %v1384_v18 = vpop.eup %1383 }
0x19a8   :  { %944 = vrot.lane.b32.xlu2 %v1384_v18, %s1424_s11 }
0x19a9   :  { %v1386_v20 = vpop.eup %1385 }
0x19aa   :  { %v922_v21 = vadd.f32 1.0, %v1386_v20 }
0x19ac   :  { %1387 = vrcp.f32 %v922_v21  ;;  %v934_v27 = vand.u32 2147483648, %v922_v21  ;;  %vm928_vm2 = vweird.f32 %v922_v21  ;;  %v932_v28 = vand.u32 2147483647, %v922_v21 }
0x19ae   :  { %v935_v29 = vor.u32 1.1754944e-38, %v934_v27  ;;  %vm933_vm4 = vcmp.eq.f32.partialorder %v932_v28, 8.507059e+37 }
0x19b2   :  { %v1388_v22 = vpop.eup %1387 }
0x19b3   :  { %v924_v23 = vmul.f32 %v1388_v22, %v922_v21  ;;  %vm929_vm1 = vweird.f32 %v1388_v22 }
0x19b4   :  { %vm930_vm3 = vmor %vm928_vm2, %vm929_vm1  ;;  %vm813_vm2 = vcmask 257026  }
0x19b5   :  { %v925_v24 = vsub.f32 1.0, %v924_v23 }
0x19b7   :  { %v926_v25 = vmul.f32 %v1388_v22, %v925_v24 }
0x19b9   :  { %v927_v26 = vadd.f32 %v1388_v22, %v926_v25 }
0x19bb   :  { %v931_v56 = vsel %vm930_vm3, %v1388_v22, %v927_v26  ;;  %vm888_vm3 = vcmask 259076  }
0x19bc   :  { %v936_v31 = vsel %vm933_vm4, %v935_v29, %v931_v56  ;;  %vm963_vm4 = vcmask 261126  }
0x19bd   :  { %v942_v33 = vmul.f32 %v940_v32, %v936_v31 }
0x1a02   :  { %v945_v30 = vpop.permute.xlu2 %944 }
0x1a03   :  { %v947_v61 = vmul.f32 %v945_v30, %v936_v31 }
0x1a05   :  { %949 = vrot.lane.b32.xlu0 %v947_v61, %s1425_s4 }
0x1a77   :  { %v950_v34 = vpop.permute.xlu0 %949 }
0x1a78   :  { %v952_v35 = vadd.f32 %v950_v34, %v942_v33 }
0x1a7a   :  { %1389 = vtanh.f32 %v952_v35  ;;  %v1012_v1 = vrot.slane %v952_v35, 6 }
0x1a80   :  { %v1390_v36 = vpop.eup %1389 }
0x1a81   :  { %955 = vrot.lane.b32.xlu1 %v1390_v36, %s1424_s11 }
0x1af3   :  { %v956_v39 = vpop.permute.xlu1 %955 }
0x1af4   :  { %v1645_v40 = vmul.f32 %v956_v39, %v936_v31 }
0x1af6   :  { %v965_v41 = vrot.slane %v1645_v40, 6 }
0x1af8   :  { %966 = vrot.lane.b32.xlu2 %v965_v41, %s1425_s4 }
0x1b52   :  { %v967_v42 = vpop.permute.xlu2 %966 }
0x1b53   :  { %1281 = vmatmul.msk.f32.vlgmr.msrb.gmra.mxu0 %vm45_vm0, %v967_v42 }
0x1bd0   :  { %v987_v13 = vpop.f32.mrf.mxu0 }
0x1bd1   :  { %v990_v46 = vadd.f32 %v987_v13, %v1651_v44 }
0x1bd3   :  { %1391 = vtanh.f32 %v990_v46  ;;  %v1282_v48 = vmul.f32 -1.442695, %v990_v46 }
0x1bd5   :  { %1393 = vpow2.f32 %v1282_v48 }
0x1bd9   :  { %v1392_v47 = vpop.eup %1391 }
0x1bda   :  { %1016 = vrot.lane.b32.xlu0 %v1392_v47, %s1424_s11 }
0x1bdb   :  { %v1394_v49 = vpop.eup %1393 }
0x1bdc   :  { %v994_v50 = vadd.f32 1.0, %v1394_v49 }
0x1bde   :  { %1395 = vrcp.f32 %v994_v50  ;;  %v1006_v54 = vand.u32 2147483648, %v994_v50  ;;  %vm1000_vm6 = vweird.f32 %v994_v50  ;;  %v1004_v58 = vand.u32 2147483647, %v994_v50 }
0x1be0   :  { %v1007_v60 = vor.u32 1.1754944e-38, %v1006_v54  ;;  %vm1005_vm9 = vcmp.eq.f32.partialorder %v1004_v58, 8.507059e+37 }
0x1be4   :  { %v1396_v51 = vpop.eup %1395 }
0x1be5   :  { %v996_v52 = vmul.f32 %v1396_v51, %v994_v50  ;;  %vm1001_vm5 = vweird.f32 %v1396_v51 }
0x1be6   :  { %vm1002_vm8 = vmor %vm1000_vm6, %vm1001_vm5  ;;  %vm1220_vm5 = vcmask 56320   ;;  %vm1224_vm6 = vcmask 54272  }
0x1be7   :  { %v997_v53 = vsub.f32 1.0, %v996_v52 }
0x1be9   :  { %v998_v55 = vmul.f32 %v1396_v51, %v997_v53 }
0x1beb   :  { %v999_v57 = vadd.f32 %v1396_v51, %v998_v55 }
0x1bed   :  { %v1003_v59 = vsel %vm1002_vm8, %v1396_v51, %v999_v57 }
0x1bee   :  { %v1008_v63 = vsel %vm1005_vm9, %v1007_v60, %v1003_v59 }
0x1bef   :  { %v1014_v2 = vmul.f32 %v1012_v1, %v1008_v63 }
0x1c4c   :  { %v1017_v62 = vpop.permute.xlu0 %1016 }
0x1c4d   :  { %v1019_v0 = vmul.f32 %v1017_v62, %v1008_v63 }
0x1c4f   :  { %1021 = vrot.lane.b32.xlu1 %v1019_v0, %s1425_s4 }
0x1cc1   :  { %v1022_v3 = vpop.permute.xlu1 %1021 }
0x1cc2   :  { %v1024_v4 = vadd.f32 %v1022_v3, %v1014_v2  ;;  %v1185_v2 = vld [vmem:[%s1717_s8 + $0x10] sm:$0xff]  ;;  %v1184_v3 = vld [vmem:[%s1717_s8 + $0x8] sm:$0xff] }
0x1cc4   :  { %1397 = vtanh.f32 %v1024_v4  ;;  %v1083_v29 = vrot.slane %v1024_v4, 6  ;;  %v1183_v4 = vld [vmem:[%s1717_s8] sm:$0xff] }
0x1cca   :  { %v1398_v5 = vpop.eup %1397 }
0x1ccb   :  { %1027 = vrot.lane.b32.xlu2 %v1398_v5, %s1424_s11 }
0x1d25   :  { %v1028_v6 = vpop.permute.xlu2 %1027 }
0x1d26   :  { %v1030_v7 = vmul.f32 %v1028_v6, %v1008_v63 }
0x1d28   :  { %1032 = vrot.lane.b32.xlu0 %v1030_v7, %s1425_s4 }
0x1d9a   :  { %v1033_v8 = vpop.permute.xlu0 %1032 }
0x1d9b   :  { %1035 = vst.msk [vmem:[#allocation2 + $0x8] sm:$0x3] %vm741_vm7, %v1033_v8  ;;  %1283 = vmatmul.msk.f32.vlgmr.msra.gmra.mxu1 %vm45_vm0, %v1033_v8 }
0x1e18   :  { %v1055_v10 = vpop.f32.mrf.mxu1 }
0x1e19   :  { %v1059_v9 = vrot.slane %v1055_v10, 6 }
0x1e1b   :  { %v1061_v12 = vadd.f32 %v1059_v9, %v1651_v44  ;;  %v1294_v9 = vld [vmem:[%s1718_s9] ss:$0 sm:$0xff] }
0x1e1d   :  { %1399 = vtanh.f32 %v1061_v12  ;;  %v1284_v15 = vmul.f32 -1.442695, %v1061_v12 }
0x1e1f   :  { %1401 = vpow2.f32 %v1284_v15 }
0x1e23   :  { %v1400_v14 = vpop.eup %1399 }
0x1e24   :  { %1087 = vrot.lane.b32.xlu1 %v1400_v14, %s1424_s11 }
0x1e25   :  { %v1402_v16 = vpop.eup %1401 }
0x1e26   :  { %v1065_v17 = vadd.f32 1.0, %v1402_v16 }
0x1e28   :  { %1403 = vrcp.f32 %v1065_v17  ;;  %v1077_v23 = vand.u32 2147483648, %v1065_v17  ;;  %vm1071_vm10 = vweird.f32 %v1065_v17  ;;  %v1075_v24 = vand.u32 2147483647, %v1065_v17 }
0x1e2a   :  { %v1078_v26 = vor.u32 1.1754944e-38, %v1077_v23  ;;  %vm1076_vm12 = vcmp.eq.f32.partialorder %v1075_v24, 8.507059e+37 }
0x1e2e   :  { %v1404_v18 = vpop.eup %1403 }
0x1e2f   :  { %v1067_v19 = vmul.f32 %v1404_v18, %v1065_v17  ;;  %vm1072_vm7 = vweird.f32 %v1404_v18 }
0x1e30   :  { %vm1073_vm11 = vmor %vm1071_vm10, %vm1072_vm7 }
0x1e31   :  { %v1068_v20 = vsub.f32 1.0, %v1067_v19 }
0x1e33   :  { %v1069_v21 = vmul.f32 %v1404_v18, %v1068_v20 }
0x1e35   :  { %v1070_v22 = vadd.f32 %v1404_v18, %v1069_v21 }
0x1e37   :  { %v1074_v25 = vsel %vm1073_vm11, %v1404_v18, %v1070_v22 }
0x1e38   :  { %v1079_v28 = vsel %vm1076_vm12, %v1078_v26, %v1074_v25 }
0x1e39   :  { %v1085_v30 = vmul.f32 %v1083_v29, %v1079_v28 }
0x1e96   :  { %v1088_v27 = vpop.permute.xlu1 %1087 }
0x1e97   :  { %v1090_v56 = vmul.f32 %v1088_v27, %v1079_v28 }
0x1e99   :  { %1092 = vrot.lane.b32.xlu2 %v1090_v56, %s1425_s4 }
0x1ef3   :  { %v1093_v31 = vpop.permute.xlu2 %1092 }
0x1ef4   :  { %v1095_v61 = vadd.f32 %v1093_v31, %v1085_v30 }
0x1ef6   :  { %1405 = vtanh.f32 %v1095_v61  ;;  %v1157_v59 = vrot.slane %v1095_v61, 6 }
0x1efc   :  { %v1406_v32 = vpop.eup %1405 }
0x1efd   :  { %1098 = vrot.lane.b32.xlu0 %v1406_v32, %s1424_s11 }
0x1f6f   :  { %v1099_v33 = vpop.permute.xlu0 %1098 }
0x1f70   :  { %v1101_v34 = vmul.f32 %v1099_v33, %v1079_v28 }
0x1f72   :  { %v1107_v35 = vrot.slane %v1101_v34, 2 }
0x1f74   :  { %1108 = vrot.lane.b32.xlu1 %v1107_v35, %s1425_s4 }
0x1fe6   :  { %v1109_v36 = vpop.permute.xlu1 %1108 }
0x1fe7   :  { %1285 = vmatmul.msk.f32.vlgmr.msrb.gmra.mxu2 %vm45_vm0, %v1109_v36 }
0x206a   :  { %v1129_v37 = vpop.f32.mrf.mxu2 }
0x206b   :  { %v1133_v38 = vrot.slane %v1129_v37, 4 }
0x206d   :  { %v1135_v39 = vadd.f32 %v1133_v38, %v1651_v44 }
0x206f   :  { %1407 = vtanh.f32 %v1135_v39  ;;  %v1286_v42 = vmul.f32 -1.442695, %v1135_v39 }
0x2071   :  { %1409 = vpow2.f32 %v1286_v42 }
0x2075   :  { %v1408_v41 = vpop.eup %1407 }
0x2076   :  { %1161 = vrot.lane.b32.xlu2 %v1408_v41, %s1424_s11 }
0x2077   :  { %v1410_v43 = vpop.eup %1409 }
0x2078   :  { %v1139_v13 = vadd.f32 1.0, %v1410_v43 }
0x207a   :  { %1411 = vrcp.f32 %v1139_v13  ;;  %v1151_v44 = vand.u32 2147483648, %v1139_v13  ;;  %vm1145_vm14 = vweird.f32 %v1139_v13  ;;  %v1149_v51 = vand.u32 2147483647, %v1139_v13 }
0x207c   :  { %v1152_v53 = vor.u32 1.1754944e-38, %v1151_v44  ;;  %vm1150_vm1 = vcmp.eq.f32.partialorder %v1149_v51, 8.507059e+37 }
0x207e   :  { %810 = vrot.lane.b32.xlu2 %v1623_v45, %s1425_s4 }
0x2080   :  { %v1412_v46 = vpop.eup %1411 }
0x2081   :  { %v1141_v47 = vmul.f32 %v1412_v46, %v1139_v13  ;;  %vm1146_vm13 = vweird.f32 %v1412_v46 }
0x2082   :  { %vm1147_vm15 = vmor %vm1145_vm14, %vm1146_vm13 }
0x2083   :  { %v1142_v48 = vsub.f32 1.0, %v1141_v47 }
0x2085   :  { %v1143_v49 = vmul.f32 %v1412_v46, %v1142_v48 }
0x2086   :  { %1103 = vrot.lane.b32.xlu2 %v1101_v34, %s1425_s4 }
0x2087   :  { %v1144_v50 = vadd.f32 %v1412_v46, %v1143_v49 }
0x2089   :  { %v1148_v52 = vsel %vm1147_vm15, %v1412_v46, %v1144_v50 }
0x208a   :  { %v1153_v55 = vsel %vm1150_vm1, %v1152_v53, %v1148_v52 }
0x208b   :  { %v1159_v60 = vmul.f32 %v1157_v59, %v1153_v55 }
0x20d0   :  { %v1162_v45 = vpop.permute.xlu2 %1161 }
0x20d1   :  { %v1164_v57 = vmul.f32 %v1162_v45, %v1153_v55 }
0x20d3   :  { %1166 = vrot.lane.b32.xlu0 %v1164_v57, %s1425_s4 }
0x20d8   :  { %v811_v54 = vpop.permute.xlu2 %810 }
0x20d9   :  { %814 = vst.msk [vmem:[#allocation2] sm:$0xc] %vm813_vm2, %v811_v54 }
0x20db   :  { %885 = vrot.lane.b32.xlu0 %v1632_v11, %s1425_s4  ;;  %v1186_v11 = vld [vmem:[%s1717_s8 + $0x18] sm:$0xff] }
0x20dc   :  { %1209 = vmatpush.msra.mxu3 %v1186_v11 }
0x20de   :  { %1210 = vmatpush.msra.mxu3 %v1185_v2 }
0x20e0   :  { %v1104_v58 = vpop.permute.xlu2 %1103  ;;  %1211 = vmatpush.msra.mxu3 %v1184_v3 }
0x20e1   :  { %1106 = vst.msk [vmem:[#allocation2 + $0x8] sm:$0xc] %vm813_vm2, %v1104_v58 }
0x20e2   :  { %1212 = vmatpush.msra.mxu3 %v1183_v4 }
0x2145   :  { %v1167_v62 = vpop.permute.xlu0 %1166 }
0x2146   :  { %v1169_v63 = vadd.f32 %v1167_v62, %v1159_v60 }
0x2148   :  { %1413 = vtanh.f32 %v1169_v63 }
0x214d   :  { %v886_v0 = vpop.permute.xlu0 %885 }
0x214e   :  { %v1414_v1 = vpop.eup %1413  ;;  %889 = vst.msk [vmem:[#allocation2] sm:$0x30] %vm888_vm3, %v886_v0 }
0x214f   :  { %1172 = vrot.lane.b32.xlu1 %v1414_v1, %s1424_s11 }
0x2157   :  { %960 = vrot.lane.b32.xlu1 %v1645_v40, %s1425_s4 }
0x21c1   :  { %v1173_v40 = vpop.permute.xlu1 %1172 }
0x21c2   :  { %v1175_v5 = vmul.f32 %v1173_v40, %v1153_v55 }
0x21c4   :  { %1177 = vrot.lane.b32.xlu0 %v1175_v5, %s1425_s4 }
0x21c9   :  { %v961_v6 = vpop.permute.xlu1 %960 }
0x21ca   :  { %964 = vst.msk [vmem:[#allocation2] sm:$0xc0] %vm963_vm4, %v961_v6 }
0x21d1   :  { %v1181_v7 = vld [vmem:[#allocation2] sm:$0xff] }
0x21d2   :  { %1287 = vmatmul.msk.f32.vlgmr.msra.gmra.mxu3 %vm45_vm0, %v1181_v7 }
0x2236   :  { %v1178_v8 = vpop.permute.xlu0 %1177 }
0x2237   :  { %1180 = vst.msk [vmem:[#allocation2 + $0x8] sm:$0x30] %vm888_vm3, %v1178_v8 }
0x223e   :  { %v1182_v10 = vld [vmem:[#allocation2 + $0x8] sm:$0x3f] }
0x223f   :  { %1288 = vmatmul.msk.f32.gmra.mxu3 %vm45_vm0, %v1182_v10 }
0x2255   :  { %v1214_v12 = vpop.f32.mrf.mxu3 }
0x2256   :  { %v1215_v14 = vadd.f32 %v1294_v9, %v1214_v12 }
0x2258   :  { %v1221_v15 = vsel %vm1220_vm5, %v1215_v14, -inf }
0x2259   :  { %1222 = vmax.xlane.f32.xlu1 %v1221_v15 }
0x22c2   :  { %v1217_v16 = vpop.f32.mrf.mxu3 }
0x22c3   :  { %v1218_v17 = vadd.f32 %v1294_v9, %v1217_v16 }
0x22c5   :  { %v1225_v18 = vsel %vm1224_vm6, %v1218_v17, -inf }
0x22c6   :  { %1226 = vmax.xlane.f32.xlu2 %v1225_v18 }
0x22cc   :  { %v1223_v19 = vpop.xlane.xlu1 %1222 }
0x22cd   :  { %v1228_v20 = vsub.f32 %v1215_v14, %v1223_v19 }
0x22cf   :  { %v1230_v21 = vmul.f32 1.442695, %v1228_v20 }
0x22d1   :  { %1415 = vpow2.f32 %v1230_v21 }
0x22d7   :  { %v1416_v22 = vpop.eup %1415 }
0x22d8   :  { %v1234_v23 = vsel %vm1220_vm5, %v1416_v22, 0.0 }
0x22d9   :  { %1235 = vadd.xlane.f32.xlu0 %v1234_v23 }
0x2339   :  { %v1227_v24 = vpop.xlane.xlu2 %1226 }
0x233a   :  { %v1229_v25 = vsub.f32 %v1218_v17, %v1227_v24 }
0x233c   :  { %v1232_v26 = vmul.f32 1.442695, %v1229_v25 }
0x233e   :  { %1417 = vpow2.f32 %v1232_v26 }
0x2344   :  { %v1418_v27 = vpop.eup %1417 }
0x2345   :  { %v1237_v28 = vsel %vm1224_vm6, %v1418_v27, 0.0 }
0x2346   :  { %1238 = vadd.xlane.f32.xlu2 %v1237_v28 }
0x234c   :  { %v1236_v56 = vpop.xlane.xlu0 %1235 }
0x234d   :  { %1419 = vlog2.f32 %v1236_v56 }
0x2353   :  { %v1420_v29 = vpop.eup %1419 }
0x2354   :  { %v1241_v30 = vmul.f32 0.6931472, %v1420_v29 }
0x2356   :  { %v1244_v31 = vadd.f32 %v1241_v30, %v1223_v19 }
0x2358   :  { %v1246_v61 = vsub.f32 %v1215_v14, %v1244_v31 }
0x235a   :  { %1248 = vst.msk [vmem:[%s1719_s10] sm:$0xff] %vm1220_vm5, %v1246_v61 }
0x23b9   :  { %v1239_v32 = vpop.xlane.xlu2 %1238 }
0x23ba   :  { %1421 = vlog2.f32 %v1239_v32 }
0x23c0   :  { %v1422_v33 = vpop.eup %1421 }
0x23c1   :  { %v1243_v34 = vmul.f32 0.6931472, %v1422_v33 }
0x23c3   :  { %v1245_v35 = vadd.f32 %v1243_v34, %v1227_v24 }
0x23c5   :  { %v1247_v36 = vsub.f32 %v1218_v17, %v1245_v35 }
0x23c7   :  { %1249 = vst.msk [vmem:[%s1719_s10 + $0x8] sm:$0x3f] %vm1224_vm6, %v1247_v36 }

</bundles_post_ra>
